<compile_context>
chip_gen: v5e
topology: v5e:2x2
jax: 0.10.0
libtpu: 0.0.40
codegen_flags: <defaults>
</compile_context>

<pallas_src>
import functools

import jax
import jax.numpy as jnp
from jax import lax
from jax.experimental import pallas as pl
from jax.experimental.pallas import tpu as pltpu

NEG = -1.0e30  # finite stand-in for -inf (keeps log-space arithmetic NaN-free)


# --------------------------------------------------------------------------
# Conv frontend: lane-dense, tiled GEMM  (Cout, M) = wT @ patT  (+bias, ReLU)
# --------------------------------------------------------------------------
def _conv_gemm_kernel(w_ref, x_ref, b_ref, o_ref):
    y = jnp.dot(w_ref[...], x_ref[...], preferred_element_type=jnp.float32)
    o_ref[...] = jnp.maximum(y + b_ref[...], 0.0)


def pallas_conv_gemm(wT, patT, bcol, tn=512):
    """wT: (Cout, Kp) bf16, patT: (Kp, M) bf16, bcol: (Cout, 1) f32 -> (Cout, M) f32."""
    Cout, Kp = wT.shape
    M = patT.shape[1]
    if M % tn != 0:
        tn = M  # fallback for tiny shapes
    return pl.pallas_call(
        _conv_gemm_kernel,
        out_shape=jax.ShapeDtypeStruct((Cout, M), jnp.float32),
        grid=(M // tn,),
        in_specs=[
            pl.BlockSpec((Cout, Kp), lambda j: (0, 0)),
            pl.BlockSpec((Kp, tn), lambda j: (0, j)),
            pl.BlockSpec((Cout, 1), lambda j: (0, 0)),
        ],
        out_specs=pl.BlockSpec((Cout, tn), lambda j: (0, j)),
        compiler_params=pltpu.CompilerParams(
            dimension_semantics=("parallel",),
            vmem_limit_bytes=32 * 1024 * 1024,   # fits v7x's 64 MiB VMEM with headroom
        ),
    )(wT, patT, bcol)


# --------------------------------------------------------------------------
# Small dense layer (+ optional activation), single block (tiny shapes only)
# --------------------------------------------------------------------------
def _linear_act_kernel(x_ref, w_ref, b_ref, o_ref, *, act):
    y = jnp.dot(x_ref[...], w_ref[...], preferred_element_type=jnp.float32)
    y = y + b_ref[...]
    if act == "relu":
        y = jnp.maximum(y, 0.0)
    elif act == "log_softmax":
        m = jnp.max(y, axis=-1, keepdims=True)
        z = y - m
        y = z - jnp.log(jnp.sum(jnp.exp(z), axis=-1, keepdims=True))
    o_ref[...] = y


def pallas_linear(x, w, b, act=None):
    M = x.shape[0]
    N = w.shape[1]
    kern = functools.partial(_linear_act_kernel, act=act)
    return pl.pallas_call(
        kern,
        out_shape=jax.ShapeDtypeStruct((M, N), jnp.float32),
    )(x.astype(jnp.float32), w.astype(jnp.float32), b.reshape(1, N).astype(jnp.float32))


# --------------------------------------------------------------------------
# Bidirectional GRU: both directions in one call (grid=(2,), parallel),
# input projection fused in-kernel, fused (H, 3H) recurrent matmul per step.
# --------------------------------------------------------------------------
def _bigru_kernel(feat_ref, wih_ref, bih_ref, whh_ref, bhh_ref, out_ref, xproj_scr):
    T, B, _ = feat_ref.shape
    H = whh_ref.shape[0]
    d = pl.program_id(0)                       # 0 = forward, 1 = backward (time reversed)

    wih = wih_ref[...]                         # (F, 3H), gates r,z,n on lanes
    bih = bih_ref[...]                         # (1, 3H)
    # Input projection fused into this kernel: no xproj HBM round-trip, no [::-1] copies.
    for t in range(T):                         # static unroll (T small)
        xproj_scr[t] = jnp.dot(feat_ref[t], wih,
                               preferred_element_type=jnp.float32) + bih

    whh = whh_ref[...]                         # (H, 3H) fused recurrent weights
    bhh = bhh_ref[...]                         # (1, 3H)

    def step(t, h):
        tt = jnp.where(d == 0, t, T - 1 - t)   # backward direction walks time in reverse
        xp = xproj_scr[tt]                     # (B, 3H)
        hp = jnp.dot(h, whh, preferred_element_type=jnp.float32) + bhh   # one MXU op/step
        r = pl.reciprocal(1.0 + jnp.exp(-(xp[:, :H] + hp[:, :H])), approx=True)
        z = pl.reciprocal(1.0 + jnp.exp(-(xp[:, H:2 * H] + hp[:, H:2 * H])), approx=True)
        n = jnp.tanh(xp[:, 2 * H:] + r * hp[:, 2 * H:])
        h_new = (1.0 - z) * n + z * h
        out_ref[tt] = h_new
        return h_new

    lax.fori_loop(0, T, step, jnp.zeros((B, H), jnp.float32), unroll=True)


def pallas_bigru(feat, wih, bih, whh, bhh):
    """feat: (T, B, F); stacked per-direction weights with leading dim 2 -> (2, T, B, H)."""
    T, B, F = feat.shape
    H = whh.shape[1]
    return pl.pallas_call(
        _bigru_kernel,
        out_shape=jax.ShapeDtypeStruct((2, T, B, H), jnp.float32),
        grid=(2,),
        in_specs=[
            pl.BlockSpec((T, B, F), lambda d: (0, 0, 0)),
            pl.BlockSpec((None, F, 3 * H), lambda d: (d, 0, 0)),
            pl.BlockSpec((None, 1, 3 * H), lambda d: (d, 0, 0)),
            pl.BlockSpec((None, H, 3 * H), lambda d: (d, 0, 0)),
            pl.BlockSpec((None, 1, 3 * H), lambda d: (d, 0, 0)),
        ],
        out_specs=pl.BlockSpec((None, T, B, H), lambda d: (d, 0, 0, 0)),
        scratch_shapes=[pltpu.VMEM((T, B, 3 * H), jnp.float32)],
        compiler_params=pltpu.CompilerParams(dimension_semantics=("parallel",)),
    )(feat, wih, bih, whh, bhh)


# --------------------------------------------------------------------------
# CTC loss: batched log-space alpha recursion, shifts via pltpu.roll (XLU).
# --------------------------------------------------------------------------
def _ctc_kernel(emit_ref, skip_ref, valid_ref, fin_ref, xlen_ref, nll_ref):
    T = emit_ref.shape[0]
    Bn, S = skip_ref.shape
    skip_b = skip_ref[...] > 0.5
    valid_b = valid_ref[...] > 0.5
    fin_b = fin_ref[...] > 0.5
    xlen = xlen_ref[...]                                        # (B, 1) int32
    s_idx = lax.broadcasted_iota(jnp.int32, (Bn, S), 1)

    alpha0 = jnp.where((s_idx <= 1) & valid_b, emit_ref[0], NEG)

    def step(t, alpha):
        # lane shifts on the XLU; circular wrap-around is killed by the s>=1 / skip masks
        prev1 = jnp.where(s_idx >= 1, pltpu.roll(alpha, shift=1, axis=1), NEG)
        prev2 = jnp.where(skip_b, pltpu.roll(alpha, shift=2, axis=1), NEG)
        mx = jnp.maximum(jnp.maximum(alpha, prev1), prev2)
        lse = mx + jnp.log(jnp.exp(alpha - mx) + jnp.exp(prev1 - mx) + jnp.exp(prev2 - mx))
        new = jnp.where(valid_b, lse + emit_ref[t], NEG)        # re-mask after LSE (keep!)
        return jnp.where(t < xlen, new, alpha)                  # per-sample input length

    alpha = lax.fori_loop(1, T, step, alpha0)

    mxf = jnp.max(jnp.where(fin_b, alpha, NEG), axis=-1, keepdims=True)        # (B, 1)
    llf = mxf + jnp.log(jnp.sum(jnp.where(fin_b, jnp.exp(alpha - mxf), 0.0),
                                axis=-1, keepdims=True))
    nll_ref[...] = -llf


def ctc_loss_pallas(log_probs_tbc, targets, input_lengths, target_lengths, blank=0):
    T, B, C = log_probs_tbc.shape
    Lmax = targets.shape[1]
    Smax = 2 * Lmax + 1
    S = pl.cdiv(Smax, 128) * 128        # pad extended-label axis to full 128-lane registers

    lp = jnp.transpose(log_probs_tbc, (1, 0, 2)).astype(jnp.float32)            # (B, T, C)

    # Extended label sequence l' = [blank, y1, blank, ..., yL, blank] (setup glue).
    s = jnp.arange(Smax)
    is_label = (s % 2) == 1
    lab_pos = jnp.clip(s // 2, 0, Lmax - 1)
    ext = jnp.where(is_label[None, :], targets[:, lab_pos], blank)              # (B, Smax)
    oht = jnp.transpose(jax.nn.one_hot(ext, C, dtype=jnp.float32), (0, 2, 1))   # (B, C, Smax)

    # Emission table emit[t,b,s] = log p(l'_s | t): tiny one-hot contraction kept as
    # wrapper setup so the kernel reads emit_ref[t] (plain vld) on the serial path.
    emit = jnp.einsum("btc,bcs->tbs", lp, oht)                                  # (T, B, Smax)
    emit = jnp.pad(emit, ((0, 0), (0, 0), (0, S - Smax)))

    Sp = 2 * target_lengths + 1
    valid = s[None, :] < Sp[:, None]
    ext_prev2 = jnp.concatenate([jnp.full((B, 2), -1, ext.dtype), ext[:, :-2]], axis=1)
    skip = is_label[None, :] & (s[None, :] >= 2) & (ext != ext_prev2)
    fin = (s[None, :] == Sp[:, None] - 1) | \
          ((s[None, :] == Sp[:, None] - 2) & (target_lengths[:, None] > 0))
    pad_m = lambda a: jnp.pad(a.astype(jnp.float32), ((0, 0), (0, S - Smax)))

    nll = pl.pallas_call(
        _ctc_kernel,
        out_shape=jax.ShapeDtypeStruct((B, 1), jnp.float32),
    )(emit, pad_m(skip), pad_m(valid), pad_m(fin),
      input_lengths.astype(jnp.int32).reshape(B, 1))[:, 0]

    # PyTorch semantics: zero_infinity=True, reduction='mean' (divide by clamped target
    # length, mean over batch) applied to the per-sample kernel outputs.
    per = jnp.where(nll > 1e29, 0.0, nll) / jnp.maximum(target_lengths, 1).astype(jnp.float32)
    return jnp.mean(per)


# --------------------------------------------------------------------------
# Model forward (LipNet-lite) + MetaLearner forward
# --------------------------------------------------------------------------
def lipnet_forward(params, x):
    B, C, T, H, W = x.shape
    Ho, Wo = H // 2, W // 2
    Cout = params["conv_w"].shape[1]

    # Conv3d(C->Cout, k=(3,3,3), stride=(1,2,2), pad=(1,1,1)) as im2col + Pallas GEMM.
    # TODO(synk): patch extraction (pure data movement) stays in JAX glue; FLOPs are in the kernel.
    xp = jnp.pad(x, ((0, 0), (0, 0), (1, 1), (1, 1), (1, 1)))
    taps = []
    for dt in range(3):
        for dh in range(3):
            for dw in range(3):
                taps.append(xp[:, :, dt:dt + T, dh::2, dw::2][:, :, :, :Ho, :Wo])
    pat = jnp.stack(taps, axis=0)                       # (27, B, C, T, Ho, Wo)
    pat = jnp.transpose(pat, (2, 0, 1, 3, 4, 5))        # (C, 27, B, T, Ho, Wo)
    K = C * 27
    M = B * T * Ho * Wo
    Kp = pl.cdiv(K, 128) * 128                          # pad contraction dim to dense lanes
    patT = pat.reshape(K, M)
    patT = jnp.pad(patT, ((0, Kp - K), (0, 0))).astype(jnp.bfloat16)
    wT = jnp.pad(params["conv_w"].T, ((0, 0), (0, Kp - K))).astype(jnp.bfloat16)   # (Cout, Kp)
    bcol = params["conv_b"].reshape(Cout, 1).astype(jnp.float32)

    conv = pallas_conv_gemm(wT, patT, bcol)             # (Cout, M), ReLU applied, lane-dense
    conv = jnp.transpose(conv.reshape(Cout, B, T, Ho, Wo), (1, 2, 3, 4, 0))

    # TODO(synk): MaxPool3d((1,2,2)) kept in JAX glue (tiny 2x2 spatial window reorder).
    pooled = conv.reshape(B, T, Ho // 2, 2, Wo // 2, 2, Cout).max(axis=(3, 5))

    feat = jnp.transpose(pooled, (1, 0, 2, 3, 4)).reshape(T, B, -1)   # (T, B, F)
    Hg = params["gru_fwd"]["whh"].shape[0]

    stack = lambda name: jnp.stack([params["gru_fwd"][name], params["gru_bwd"][name]], axis=0)
    hboth = pallas_bigru(feat, stack("wih"), stack("bih"), stack("whh"), stack("bhh"))
    hcat = jnp.concatenate([hboth[0], hboth[1]], axis=-1)             # (T, B, 2H)

    V = params["fc_w"].shape[1]
    # Linear head fused with log_softmax(dim=-1) inside the Pallas kernel.
    logp = pallas_linear(hcat.reshape(T * B, 2 * Hg), params["fc_w"], params["fc_b"],
                         act="log_softmax")
    return logp.reshape(T, B, V)


def meta_learner_forward(params, x, y, xlens, ylens):
    log_probs = lipnet_forward(params, x)               # (T, B, V), log_softmax applied
    return ctc_loss_pallas(log_probs, y, xlens.reshape(-1), ylens.reshape(-1))


# --------------------------------------------------------------------------
# Deterministic parameter init (synthetic weights, shapes documented vs PyTorch)
# --------------------------------------------------------------------------
def init_params(key, vocab_size, cin=3, cout=8, feat=128, hidden=32):
    ks = jax.random.split(key, 12)
    r = lambda k, shape, s=0.1: s * jax.random.normal(k, shape, jnp.float32)

    def gru_p(k1, k2, k3, k4):
        return {
            "wih": r(k1, (feat, 3 * hidden)),   # torch W_ih (3H, F) transposed; gates r,z,n on lanes
            "bih": r(k2, (1, 3 * hidden)),
            "whh": r(k3, (hidden, 3 * hidden)), # fused recurrent weights (one h@whh per step)
            "bhh": r(k4, (1, 3 * hidden)),
        }

    return {
        "conv_w": r(ks[0], (cin * 27, cout)),   # torch (Cout, Cin, 3,3,3) flattened+transposed
        "conv_b": r(ks[1], (cout,)),
        "gru_fwd": gru_p(ks[2], ks[3], ks[4], ks[5]),
        "gru_bwd": gru_p(ks[6], ks[7], ks[8], ks[9]),
        "fc_w": r(ks[10], (2 * hidden, vocab_size)),
        "fc_b": r(ks[11], (vocab_size,)),
    }


if __name__ == "__main__":
    key = jax.random.PRNGKey(0)
    kp, kx, ky = jax.random.split(key, 3)

    B, Cin, T, H, W = 2, 3, 8, 16, 16
    vocab_size = 28                      # class 0 = CTC blank (F.ctc_loss default)
    hidden = 32
    feat = 8 * (H // 4) * (W // 4)       # 128 features per frame after conv+pool

    params = init_params(kp, vocab_size, cin=Cin, cout=8, feat=feat, hidden=hidden)

    x = jax.random.normal(kx, (B, Cin, T, H, W), jnp.float32)
    Lmax = 4
    y = jax.random.randint(ky, (B, Lmax), 1, vocab_size, dtype=jnp.int32)
    xlens = jnp.array([[T], [T]], dtype=jnp.int32)   # .reshape(-1) happens in forward (like PyTorch)
    ylens = jnp.array([[3], [4]], dtype=jnp.int32)

    fwd = jax.jit(meta_learner_forward)
    loss = fwd(params, x, y, xlens, ylens)
    jax.block_until_ready(loss)
    assert loss.shape == () and bool(jnp.isfinite(loss))
    print("KERNEL_OK")
</pallas_src>

<mosaic_0001>
module attributes {stable_mosaic.version = 11 : i64} {
  func.func @_conv_gemm_kernel(%arg0: i32, %arg1: memref<8x128xbf16, #tpu.memory_space<vmem>>, %arg2: memref<128x512xbf16, #tpu.memory_space<vmem>>, %arg3: memref<8x1xf32, #tpu.memory_space<vmem>>, %arg4: memref<8x512xf32, #tpu.memory_space<vmem>>) attributes {dimension_semantics = [#tpu.dimension_semantics<parallel>], iteration_bounds = array<i64: 2>, scalar_prefetch = 0 : i64, scratch_operands = 0 : i64, tpu.core_type = #tpu.core_type<tc>, window_params = [{pipeline_mode = #tpu.pipeline_mode<synchronous>, transform_indices = @transform_0, window_bounds = array<i64: 8, 128>}, {transform_indices = @transform_1, window_bounds = array<i64: 128, 512>}, {pipeline_mode = #tpu.pipeline_mode<synchronous>, transform_indices = @transform_2, window_bounds = array<i64: 8, 1>}, {transform_indices = @transform_3, window_bounds = array<i64: 8, 512>}]} {
    %c0 = arith.constant 0 : index
    %c0_0 = arith.constant 0 : index
    %0 = vector.load %arg1[%c0, %c0_0] : memref<8x128xbf16, #tpu.memory_space<vmem>>, vector<8x128xbf16>
    %c0_1 = arith.constant 0 : index
    %c0_2 = arith.constant 0 : index
    %1 = vector.load %arg2[%c0_1, %c0_2] : memref<128x512xbf16, #tpu.memory_space<vmem>>, vector<128x512xbf16>
    %cst = arith.constant dense<0.000000e+00> : vector<8x512xf32>
    %2 = tpu.matmul %0, %1, %cst {dimension_numbers = #tpu.dot_dimension_numbers<[1], [0], [0], [1], [0, 0, 1, 1], [], []>} : vector<8x128xbf16>, vector<128x512xbf16>, vector<8x512xf32> -> vector<8x512xf32>
    %c0_3 = arith.constant 0 : index
    %c0_4 = arith.constant 0 : index
    %3 = vector.load %arg3[%c0_3, %c0_4] : memref<8x1xf32, #tpu.memory_space<vmem>>, vector<8x1xf32>
    %4 = vector.broadcast %3 : vector<8x1xf32> to vector<8x512xf32>
    %5 = arith.addf %2, %4 : vector<8x512xf32>
    %cst_5 = arith.constant 0.000000e+00 : f32
    %6 = vector.broadcast %cst_5 : f32 to vector<8x512xf32>
    %7 = arith.maximumf %5, %6 : vector<8x512xf32>
    %c0_6 = arith.constant 0 : index
    %c0_7 = arith.constant 0 : index
    %8 = vector.load %arg4[%c0_6, %c0_7] : memref<8x512xf32, #tpu.memory_space<vmem>>, vector<8x512xf32>
    tpu.vector_store %arg4[%c0_6, %c0_7], %7 {strides = array<i32>} : memref<8x512xf32, #tpu.memory_space<vmem>>, vector<8x512xf32>,
    return
  }
  func.func @transform_0(%arg0: i32) -> (i32, i32) {
    %c0_i32 = arith.constant 0 : i32
    %c0_i32_0 = arith.constant 0 : i32
    %c0_i32_1 = arith.constant 0 : i32
    return %c0_i32, %c0_i32_0 : i32, i32
  }
  func.func @transform_1(%arg0: i32) -> (i32, i32) {
    %c0_i32 = arith.constant 0 : i32
    %c0_i32_0 = arith.constant 0 : i32
    return %c0_i32, %arg0 : i32, i32
  }
  func.func @transform_2(%arg0: i32) -> (i32, i32) {
    %c0_i32 = arith.constant 0 : i32
    %c0_i32_0 = arith.constant 0 : i32
    %c0_i32_1 = arith.constant 0 : i32
    return %c0_i32, %c0_i32_0 : i32, i32
  }
  func.func @transform_3(%arg0: i32) -> (i32, i32) {
    %c0_i32 = arith.constant 0 : i32
    %c0_i32_0 = arith.constant 0 : i32
    return %c0_i32, %arg0 : i32, i32
  }
}

module attributes {stable_mosaic.version = 11 : i64} {
  func.func @_bigru_kernel(%arg0: i32, %arg1: memref<8x2x128xf32, #tpu.memory_space<vmem>>, %arg2: memref<1x128x96xf32, #tpu.memory_space<vmem>>, %arg3: memref<1x1x96xf32, #tpu.memory_space<vmem>>, %arg4: memref<1x32x96xf32, #tpu.memory_space<vmem>>, %arg5: memref<1x1x96xf32, #tpu.memory_space<vmem>>, %arg6: memref<1x8x2x32xf32, #tpu.memory_space<vmem>>, %arg7: memref<8x2x96xf32, #tpu.memory_space<vmem>>) attributes {dimension_semantics = [#tpu.dimension_semantics<parallel>], iteration_bounds = array<i64: 2>, scalar_prefetch = 0 : i64, scratch_operands = 1 : i64, tpu.core_type = #tpu.core_type<tc>, window_params = [{pipeline_mode = #tpu.pipeline_mode<synchronous>, transform_indices = @transform_0, window_bounds = array<i64: 8, 2, 128>}, {transform_indices = @transform_1, window_bounds = array<i64: 1, 128, 96>}, {transform_indices = @transform_2, window_bounds = array<i64: 1, 1, 96>}, {transform_indices = @transform_3, window_bounds = array<i64: 1, 32, 96>}, {transform_indices = @transform_4, window_bounds = array<i64: 1, 1, 96>}, {transform_indices = @transform_5, window_bounds = array<i64: 1, 8, 2, 32>}]} {
    %c0 = arith.constant 0 : index
    %c0_0 = arith.constant 0 : index
    %c0_1 = arith.constant 0 : index
    %0 = vector.load %arg2[%c0, %c0_0, %c0_1] : memref<1x128x96xf32, #tpu.memory_space<vmem>>, vector<1x128x96xf32>
    %1 = vector.shape_cast %0 : vector<1x128x96xf32> to vector<128x96xf32>
    %c0_2 = arith.constant 0 : index
    %c0_3 = arith.constant 0 : index
    %c0_4 = arith.constant 0 : index
    %2 = vector.load %arg3[%c0_2, %c0_3, %c0_4] : memref<1x1x96xf32, #tpu.memory_space<vmem>>, vector<1x1x96xf32>
    %3 = vector.shape_cast %2 : vector<1x1x96xf32> to vector<1x96xf32>
    %c0_5 = arith.constant 0 : index
    %c0_6 = arith.constant 0 : index
    %c0_7 = arith.constant 0 : index
    %4 = vector.load %arg1[%c0_5, %c0_6, %c0_7] : memref<8x2x128xf32, #tpu.memory_space<vmem>>, vector<1x2x128xf32>
    %5 = vector.shape_cast %4 : vector<1x2x128xf32> to vector<2x128xf32>
    %cst = arith.constant dense<0.000000e+00> : vector<2x96xf32>
    %6 = tpu.matmul %5, %1, %cst {dimension_numbers = #tpu.dot_dimension_numbers<[1], [0], [0], [1], [0, 0, 1, 1], [], []>} : vector<2x128xf32>, vector<128x96xf32>, vector<2x96xf32> -> vector<2x96xf32>
    %7 = vector.broadcast %3 : vector<1x96xf32> to vector<2x96xf32>
    %8 = arith.addf %6, %7 : vector<2x96xf32>
    %c0_8 = arith.constant 0 : index
    %c0_9 = arith.constant 0 : index
    %c0_10 = arith.constant 0 : index
    %9 = vector.load %arg7[%c0_8, %c0_9, %c0_10] : memref<8x2x96xf32, #tpu.memory_space<vmem>>, vector<1x2x96xf32>
    %10 = vector.shape_cast %9 : vector<1x2x96xf32> to vector<2x96xf32>
    %11 = vector.shape_cast %8 : vector<2x96xf32> to vector<1x2x96xf32>
    tpu.vector_store %arg7[%c0_8, %c0_9, %c0_10], %11 {strides = array<i32>} : memref<8x2x96xf32, #tpu.memory_space<vmem>>, vector<1x2x96xf32>,
    %c1 = arith.constant 1 : index
    %c0_11 = arith.constant 0 : index
    %c0_12 = arith.constant 0 : index
    %12 = vector.load %arg1[%c1, %c0_11, %c0_12] : memref<8x2x128xf32, #tpu.memory_space<vmem>>, vector<1x2x128xf32>
    %13 = vector.shape_cast %12 : vector<1x2x128xf32> to vector<2x128xf32>
    %cst_13 = arith.constant dense<0.000000e+00> : vector<2x96xf32>
    %14 = tpu.matmul %13, %1, %cst_13 {dimension_numbers = #tpu.dot_dimension_numbers<[1], [0], [0], [1], [0, 0, 1, 1], [], []>} : vector<2x128xf32>, vector<128x96xf32>, vector<2x96xf32> -> vector<2x96xf32>
    %15 = vector.broadcast %3 : vector<1x96xf32> to vector<2x96xf32>
    %16 = arith.addf %14, %15 : vector<2x96xf32>
    %c1_14 = arith.constant 1 : index
    %c0_15 = arith.constant 0 : index
    %c0_16 = arith.constant 0 : index
    %17 = vector.load %arg7[%c1_14, %c0_15, %c0_16] : memref<8x2x96xf32, #tpu.memory_space<vmem>>, vector<1x2x96xf32>
    %18 = vector.shape_cast %17 : vector<1x2x96xf32> to vector<2x96xf32>
    %19 = vector.shape_cast %16 : vector<2x96xf32> to vector<1x2x96xf32>
    tpu.vector_store %arg7[%c1_14, %c0_15, %c0_16], %19 {strides = array<i32>} : memref<8x2x96xf32, #tpu.memory_space<vmem>>, vector<1x2x96xf32>,
    %c2 = arith.constant 2 : index
    %c0_17 = arith.constant 0 : index
    %c0_18 = arith.constant 0 : index
    %20 = vector.load %arg1[%c2, %c0_17, %c0_18] : memref<8x2x128xf32, #tpu.memory_space<vmem>>, vector<1x2x128xf32>
    %21 = vector.shape_cast %20 : vector<1x2x128xf32> to vector<2x128xf32>
    %cst_19 = arith.constant dense<0.000000e+00> : vector<2x96xf32>
    %22 = tpu.matmul %21, %1, %cst_19 {dimension_numbers = #tpu.dot_dimension_numbers<[1], [0], [0], [1], [0, 0, 1, 1], [], []>} : vector<2x128xf32>, vector<128x96xf32>, vector<2x96xf32> -> vector<2x96xf32>
    %23 = vector.broadcast %3 : vector<1x96xf32> to vector<2x96xf32>
    %24 = arith.addf %22, %23 : vector<2x96xf32>
    %c2_20 = arith.constant 2 : index
    %c0_21 = arith.constant 0 : index
    %c0_22 = arith.constant 0 : index
    %25 = vector.load %arg7[%c2_20, %c0_21, %c0_22] : memref<8x2x96xf32, #tpu.memory_space<vmem>>, vector<1x2x96xf32>
    %26 = vector.shape_cast %25 : vector<1x2x96xf32> to vector<2x96xf32>
    %27 = vector.shape_cast %24 : vector<2x96xf32> to vector<1x2x96xf32>
    tpu.vector_store %arg7[%c2_20, %c0_21, %c0_22], %27 {strides = array<i32>} : memref<8x2x96xf32, #tpu.memory_space<vmem>>, vector<1x2x96xf32>,
    %c3 = arith.constant 3 : index
    %c0_23 = arith.constant 0 : index
    %c0_24 = arith.constant 0 : index
    %28 = vector.load %arg1[%c3, %c0_23, %c0_24] : memref<8x2x128xf32, #tpu.memory_space<vmem>>, vector<1x2x128xf32>
    %29 = vector.shape_cast %28 : vector<1x2x128xf32> to vector<2x128xf32>
    %cst_25 = arith.constant dense<0.000000e+00> : vector<2x96xf32>
    %30 = tpu.matmul %29, %1, %cst_25 {dimension_numbers = #tpu.dot_dimension_numbers<[1], [0], [0], [1], [0, 0, 1, 1], [], []>} : vector<2x128xf32>, vector<128x96xf32>, vector<2x96xf32> -> vector<2x96xf32>
    %31 = vector.broadcast %3 : vector<1x96xf32> to vector<2x96xf32>
    %32 = arith.addf %30, %31 : vector<2x96xf32>
    %c3_26 = arith.constant 3 : index
    %c0_27 = arith.constant 0 : index
    %c0_28 = arith.constant 0 : index
    %33 = vector.load %arg7[%c3_26, %c0_27, %c0_28] : memref<8x2x96xf32, #tpu.memory_space<vmem>>, vector<1x2x96xf32>
    %34 = vector.shape_cast %33 : vector<1x2x96xf32> to vector<2x96xf32>
    %35 = vector.shape_cast %32 : vector<2x96xf32> to vector<1x2x96xf32>
    tpu.vector_store %arg7[%c3_26, %c0_27, %c0_28], %35 {strides = array<i32>} : memref<8x2x96xf32, #tpu.memory_space<vmem>>, vector<1x2x96xf32>,
    %c4 = arith.constant 4 : index
    %c0_29 = arith.constant 0 : index
    %c0_30 = arith.constant 0 : index
    %36 = vector.load %arg1[%c4, %c0_29, %c0_30] : memref<8x2x128xf32, #tpu.memory_space<vmem>>, vector<1x2x128xf32>
    %37 = vector.shape_cast %36 : vector<1x2x128xf32> to vector<2x128xf32>
    %cst_31 = arith.constant dense<0.000000e+00> : vector<2x96xf32>
    %38 = tpu.matmul %37, %1, %cst_31 {dimension_numbers = #tpu.dot_dimension_numbers<[1], [0], [0], [1], [0, 0, 1, 1], [], []>} : vector<2x128xf32>, vector<128x96xf32>, vector<2x96xf32> -> vector<2x96xf32>
    %39 = vector.broadcast %3 : vector<1x96xf32> to vector<2x96xf32>
    %40 = arith.addf %38, %39 : vector<2x96xf32>
    %c4_32 = arith.constant 4 : index
    %c0_33 = arith.constant 0 : index
    %c0_34 = arith.constant 0 : index
    %41 = vector.load %arg7[%c4_32, %c0_33, %c0_34] : memref<8x2x96xf32, #tpu.memory_space<vmem>>, vector<1x2x96xf32>
    %42 = vector.shape_cast %41 : vector<1x2x96xf32> to vector<2x96xf32>
    %43 = vector.shape_cast %40 : vector<2x96xf32> to vector<1x2x96xf32>
    tpu.vector_store %arg7[%c4_32, %c0_33, %c0_34], %43 {strides = array<i32>} : memref<8x2x96xf32, #tpu.memory_space<vmem>>, vector<1x2x96xf32>,
    %c5 = arith.constant 5 : index
    %c0_35 = arith.constant 0 : index
    %c0_36 = arith.constant 0 : index
    %44 = vector.load %arg1[%c5, %c0_35, %c0_36] : memref<8x2x128xf32, #tpu.memory_space<vmem>>, vector<1x2x128xf32>
    %45 = vector.shape_cast %44 : vector<1x2x128xf32> to vector<2x128xf32>
    %cst_37 = arith.constant dense<0.000000e+00> : vector<2x96xf32>
    %46 = tpu.matmul %45, %1, %cst_37 {dimension_numbers = #tpu.dot_dimension_numbers<[1], [0], [0], [1], [0, 0, 1, 1], [], []>} : vector<2x128xf32>, vector<128x96xf32>, vector<2x96xf32> -> vector<2x96xf32>
    %47 = vector.broadcast %3 : vector<1x96xf32> to vector<2x96xf32>
    %48 = arith.addf %46, %47 : vector<2x96xf32>
    %c5_38 = arith.constant 5 : index
    %c0_39 = arith.constant 0 : index
    %c0_40 = arith.constant 0 : index
    %49 = vector.load %arg7[%c5_38, %c0_39, %c0_40] : memref<8x2x96xf32, #tpu.memory_space<vmem>>, vector<1x2x96xf32>
    %50 = vector.shape_cast %49 : vector<1x2x96xf32> to vector<2x96xf32>
    %51 = vector.shape_cast %48 : vector<2x96xf32> to vector<1x2x96xf32>
    tpu.vector_store %arg7[%c5_38, %c0_39, %c0_40], %51 {strides = array<i32>} : memref<8x2x96xf32, #tpu.memory_space<vmem>>, vector<1x2x96xf32>,
    %c6 = arith.constant 6 : index
    %c0_41 = arith.constant 0 : index
    %c0_42 = arith.constant 0 : index
    %52 = vector.load %arg1[%c6, %c0_41, %c0_42] : memref<8x2x128xf32, #tpu.memory_space<vmem>>, vector<1x2x128xf32>
    %53 = vector.shape_cast %52 : vector<1x2x128xf32> to vector<2x128xf32>
    %cst_43 = arith.constant dense<0.000000e+00> : vector<2x96xf32>
    %54 = tpu.matmul %53, %1, %cst_43 {dimension_numbers = #tpu.dot_dimension_numbers<[1], [0], [0], [1], [0, 0, 1, 1], [], []>} : vector<2x128xf32>, vector<128x96xf32>, vector<2x96xf32> -> vector<2x96xf32>
    %55 = vector.broadcast %3 : vector<1x96xf32> to vector<2x96xf32>
    %56 = arith.addf %54, %55 : vector<2x96xf32>
    %c6_44 = arith.constant 6 : index
    %c0_45 = arith.constant 0 : index
    %c0_46 = arith.constant 0 : index
    %57 = vector.load %arg7[%c6_44, %c0_45, %c0_46] : memref<8x2x96xf32, #tpu.memory_space<vmem>>, vector<1x2x96xf32>
    %58 = vector.shape_cast %57 : vector<1x2x96xf32> to vector<2x96xf32>
    %59 = vector.shape_cast %56 : vector<2x96xf32> to vector<1x2x96xf32>
    tpu.vector_store %arg7[%c6_44, %c0_45, %c0_46], %59 {strides = array<i32>} : memref<8x2x96xf32, #tpu.memory_space<vmem>>, vector<1x2x96xf32>,
    %c7 = arith.constant 7 : index
    %c0_47 = arith.constant 0 : index
    %c0_48 = arith.constant 0 : index
    %60 = vector.load %arg1[%c7, %c0_47, %c0_48] : memref<8x2x128xf32, #tpu.memory_space<vmem>>, vector<1x2x128xf32>
    %61 = vector.shape_cast %60 : vector<1x2x128xf32> to vector<2x128xf32>
    %cst_49 = arith.constant dense<0.000000e+00> : vector<2x96xf32>
    %62 = tpu.matmul %61, %1, %cst_49 {dimension_numbers = #tpu.dot_dimension_numbers<[1], [0], [0], [1], [0, 0, 1, 1], [], []>} : vector<2x128xf32>, vector<128x96xf32>, vector<2x96xf32> -> vector<2x96xf32>
    %63 = vector.broadcast %3 : vector<1x96xf32> to vector<2x96xf32>
    %64 = arith.addf %62, %63 : vector<2x96xf32>
    %c7_50 = arith.constant 7 : index
    %c0_51 = arith.constant 0 : index
    %c0_52 = arith.constant 0 : index
    %65 = vector.load %arg7[%c7_50, %c0_51, %c0_52] : memref<8x2x96xf32, #tpu.memory_space<vmem>>, vector<1x2x96xf32>
    %66 = vector.shape_cast %65 : vector<1x2x96xf32> to vector<2x96xf32>
    %67 = vector.shape_cast %64 : vector<2x96xf32> to vector<1x2x96xf32>
    tpu.vector_store %arg7[%c7_50, %c0_51, %c0_52], %67 {strides = array<i32>} : memref<8x2x96xf32, #tpu.memory_space<vmem>>, vector<1x2x96xf32>,
    %c0_53 = arith.constant 0 : index
    %c0_54 = arith.constant 0 : index
    %c0_55 = arith.constant 0 : index
    %68 = vector.load %arg4[%c0_53, %c0_54, %c0_55] : memref<1x32x96xf32, #tpu.memory_space<vmem>>, vector<1x32x96xf32>
    %69 = vector.shape_cast %68 : vector<1x32x96xf32> to vector<32x96xf32>
    %c0_56 = arith.constant 0 : index
    %c0_57 = arith.constant 0 : index
    %c0_58 = arith.constant 0 : index
    %70 = vector.load %arg5[%c0_56, %c0_57, %c0_58] : memref<1x1x96xf32, #tpu.memory_space<vmem>>, vector<1x1x96xf32>
    %71 = vector.shape_cast %70 : vector<1x1x96xf32> to vector<1x96xf32>
    %cst_59 = arith.constant 0.000000e+00 : f32
    %72 = vector.broadcast %cst_59 : f32 to vector<2x32xf32>
    %c0_i32 = arith.constant 0 : i32
    %c0_i32_60 = arith.constant 0 : i32
    %73 = arith.cmpi eq, %arg0, %c0_i32_60 : i32
    %c7_i32 = arith.constant 7 : i32
    %74 = arith.subi %c7_i32, %c0_i32 : i32
    %75 = arith.select %73, %c0_i32, %74 : i32
    %76 = arith.index_cast %75 : i32 to index
    %c0_61 = arith.constant 0 : index
    %c0_62 = arith.constant 0 : index
    %77 = vector.load %arg7[%76, %c0_61, %c0_62] : memref<8x2x96xf32, #tpu.memory_space<vmem>>, vector<1x2x96xf32>
    %78 = vector.shape_cast %77 : vector<1x2x96xf32> to vector<2x96xf32>
    %cst_63 = arith.constant dense<0.000000e+00> : vector<2x96xf32>
    %79 = tpu.matmul %72, %69, %cst_63 {dimension_numbers = #tpu.dot_dimension_numbers<[1], [0], [0], [1], [0, 0, 1, 1], [], []>} : vector<2x32xf32>, vector<32x96xf32>, vector<2x96xf32> -> vector<2x96xf32>
    %80 = vector.broadcast %71 : vector<1x96xf32> to vector<2x96xf32>
    %81 = arith.addf %79, %80 : vector<2x96xf32>
    %82 = vector.extract_strided_slice %78 {offsets = [0, 0], sizes = [2, 32], strides = [1, 1]} : vector<2x96xf32> to vector<2x32xf32>
    %83 = vector.extract_strided_slice %81 {offsets = [0, 0], sizes = [2, 32], strides = [1, 1]} : vector<2x96xf32> to vector<2x32xf32>
    %84 = arith.addf %82, %83 : vector<2x32xf32>
    %cst_64 = arith.constant 0.000000e+00 : f32
    %85 = vector.broadcast %cst_64 : f32 to vector<2x32xf32>
    %86 = arith.subf %85, %84 : vector<2x32xf32>
    %87 = math.exp %86 : vector<2x32xf32>
    %cst_65 = arith.constant 1.000000e+00 : f32
    %88 = vector.broadcast %cst_65 : f32 to vector<2x32xf32>
    %89 = arith.addf %88, %87 : vector<2x32xf32>
    %90 = tpu.reciprocal %89 {approx = true} : vector<2x32xf32> -> vector<2x32xf32>
    %91 = vector.extract_strided_slice %78 {offsets = [0, 32], sizes = [2, 32], strides = [1, 1]} : vector<2x96xf32> to vector<2x32xf32>
    %92 = vector.extract_strided_slice %81 {offsets = [0, 32], sizes = [2, 32], strides = [1, 1]} : vector<2x96xf32> to vector<2x32xf32>
    %93 = arith.addf %91, %92 : vector<2x32xf32>
    %cst_66 = arith.constant 0.000000e+00 : f32
    %94 = vector.broadcast %cst_66 : f32 to vector<2x32xf32>
    %95 = arith.subf %94, %93 : vector<2x32xf32>
    %96 = math.exp %95 : vector<2x32xf32>
    %cst_67 = arith.constant 1.000000e+00 : f32
    %97 = vector.broadcast %cst_67 : f32 to vector<2x32xf32>
    %98 = arith.addf %97, %96 : vector<2x32xf32>
    %99 = tpu.reciprocal %98 {approx = true} : vector<2x32xf32> -> vector<2x32xf32>
    %100 = vector.extract_strided_slice %78 {offsets = [0, 64], sizes = [2, 32], strides = [1, 1]} : vector<2x96xf32> to vector<2x32xf32>
    %101 = vector.extract_strided_slice %81 {offsets = [0, 64], sizes = [2, 32], strides = [1, 1]} : vector<2x96xf32> to vector<2x32xf32>
    %102 = arith.mulf %90, %101 : vector<2x32xf32>
    %103 = arith.addf %100, %102 : vector<2x32xf32>
    %104 = math.tanh %103 : vector<2x32xf32>
    %cst_68 = arith.constant 1.000000e+00 : f32
    %105 = vector.broadcast %cst_68 : f32 to vector<2x32xf32>
    %106 = arith.subf %105, %99 : vector<2x32xf32>
    %107 = arith.mulf %106, %104 : vector<2x32xf32>
    %108 = arith.mulf %99, %72 : vector<2x32xf32>
    %109 = arith.addf %107, %108 : vector<2x32xf32>
    %c0_69 = arith.constant 0 : index
    %110 = arith.index_cast %75 : i32 to index
    %c0_70 = arith.constant 0 : index
    %c0_71 = arith.constant 0 : index
    %111 = vector.load %arg6[%c0_69, %110, %c0_70, %c0_71] : memref<1x8x2x32xf32, #tpu.memory_space<vmem>>, vector<1x1x2x32xf32>
    %112 = vector.shape_cast %111 : vector<1x1x2x32xf32> to vector<2x32xf32>
    %113 = vector.shape_cast %109 : vector<2x32xf32> to vector<1x1x2x32xf32>
    tpu.vector_store %arg6[%c0_69, %110, %c0_70, %c0_71], %113 {strides = array<i32>} : memref<1x8x2x32xf32, #tpu.memory_space<vmem>>, vector<1x1x2x32xf32>,
    %c1_i32 = arith.constant 1 : i32
    %c0_i32_72 = arith.constant 0 : i32
    %114 = arith.cmpi eq, %arg0, %c0_i32_72 : i32
    %c7_i32_73 = arith.constant 7 : i32
    %115 = arith.subi %c7_i32_73, %c1_i32 : i32
    %116 = arith.select %114, %c1_i32, %115 : i32
    %117 = arith.index_cast %116 : i32 to index
    %c0_74 = arith.constant 0 : index
    %c0_75 = arith.constant 0 : index
    %118 = vector.load %arg7[%117, %c0_74, %c0_75] : memref<8x2x96xf32, #tpu.memory_space<vmem>>, vector<1x2x96xf32>
    %119 = vector.shape_cast %118 : vector<1x2x96xf32> to vector<2x96xf32>
    %cst_76 = arith.constant dense<0.000000e+00> : vector<2x96xf32>
    %120 = tpu.matmul %109, %69, %cst_76 {dimension_numbers = #tpu.dot_dimension_numbers<[1], [0], [0], [1], [0, 0, 1, 1], [], []>} : vector<2x32xf32>, vector<32x96xf32>, vector<2x96xf32> -> vector<2x96xf32>
    %121 = vector.broadcast %71 : vector<1x96xf32> to vector<2x96xf32>
    %122 = arith.addf %120, %121 : vector<2x96xf32>
    %123 = vector.extract_strided_slice %119 {offsets = [0, 0], sizes = [2, 32], strides = [1, 1]} : vector<2x96xf32> to vector<2x32xf32>
    %124 = vector.extract_strided_slice %122 {offsets = [0, 0], sizes = [2, 32], strides = [1, 1]} : vector<2x96xf32> to vector<2x32xf32>
    %125 = arith.addf %123, %124 : vector<2x32xf32>
    %cst_77 = arith.constant 0.000000e+00 : f32
    %126 = vector.broadcast %cst_77 : f32 to vector<2x32xf32>
    %127 = arith.subf %126, %125 : vector<2x32xf32>
    %128 = math.exp %127 : vector<2x32xf32>
    %cst_78 = arith.constant 1.000000e+00 : f32
    %129 = vector.broadcast %cst_78 : f32 to vector<2x32xf32>
    %130 = arith.addf %129, %128 : vector<2x32xf32>
    %131 = tpu.reciprocal %130 {approx = true} : vector<2x32xf32> -> vector<2x32xf32>
    %132 = vector.extract_strided_slice %119 {offsets = [0, 32], sizes = [2, 32], strides = [1, 1]} : vector<2x96xf32> to vector<2x32xf32>
    %133 = vector.extract_strided_slice %122 {offsets = [0, 32], sizes = [2, 32], strides = [1, 1]} : vector<2x96xf32> to vector<2x32xf32>
    %134 = arith.addf %132, %133 : vector<2x32xf32>
    %cst_79 = arith.constant 0.000000e+00 : f32
    %135 = vector.broadcast %cst_79 : f32 to vector<2x32xf32>
    %136 = arith.subf %135, %134 : vector<2x32xf32>
    %137 = math.exp %136 : vector<2x32xf32>
    %cst_80 = arith.constant 1.000000e+00 : f32
    %138 = vector.broadcast %cst_80 : f32 to vector<2x32xf32>
    %139 = arith.addf %138, %137 : vector<2x32xf32>
    %140 = tpu.reciprocal %139 {approx = true} : vector<2x32xf32> -> vector<2x32xf32>
    %141 = vector.extract_strided_slice %119 {offsets = [0, 64], sizes = [2, 32], strides = [1, 1]} : vector<2x96xf32> to vector<2x32xf32>
    %142 = vector.extract_strided_slice %122 {offsets = [0, 64], sizes = [2, 32], strides = [1, 1]} : vector<2x96xf32> to vector<2x32xf32>
    %143 = arith.mulf %131, %142 : vector<2x32xf32>
    %144 = arith.addf %141, %143 : vector<2x32xf32>
    %145 = math.tanh %144 : vector<2x32xf32>
    %cst_81 = arith.constant 1.000000e+00 : f32
    %146 = vector.broadcast %cst_81 : f32 to vector<2x32xf32>
    %147 = arith.subf %146, %140 : vector<2x32xf32>
    %148 = arith.mulf %147, %145 : vector<2x32xf32>
    %149 = arith.mulf %140, %109 : vector<2x32xf32>
    %150 = arith.addf %148, %149 : vector<2x32xf32>
    %c0_82 = arith.constant 0 : index
    %151 = arith.index_cast %116 : i32 to index
    %c0_83 = arith.constant 0 : index
    %c0_84 = arith.constant 0 : index
    %152 = vector.load %arg6[%c0_82, %151, %c0_83, %c0_84] : memref<1x8x2x32xf32, #tpu.memory_space<vmem>>, vector<1x1x2x32xf32>
    %153 = vector.shape_cast %152 : vector<1x1x2x32xf32> to vector<2x32xf32>
    %154 = vector.shape_cast %150 : vector<2x32xf32> to vector<1x1x2x32xf32>
    tpu.vector_store %arg6[%c0_82, %151, %c0_83, %c0_84], %154 {strides = array<i32>} : memref<1x8x2x32xf32, #tpu.memory_space<vmem>>, vector<1x1x2x32xf32>,
    %c2_i32 = arith.constant 2 : i32
    %c0_i32_85 = arith.constant 0 : i32
    %155 = arith.cmpi eq, %arg0, %c0_i32_85 : i32
    %c7_i32_86 = arith.constant 7 : i32
    %156 = arith.subi %c7_i32_86, %c2_i32 : i32
    %157 = arith.select %155, %c2_i32, %156 : i32
    %158 = arith.index_cast %157 : i32 to index
    %c0_87 = arith.constant 0 : index
    %c0_88 = arith.constant 0 : index
    %159 = vector.load %arg7[%158, %c0_87, %c0_88] : memref<8x2x96xf32, #tpu.memory_space<vmem>>, vector<1x2x96xf32>
    %160 = vector.shape_cast %159 : vector<1x2x96xf32> to vector<2x96xf32>
    %cst_89 = arith.constant dense<0.000000e+00> : vector<2x96xf32>
    %161 = tpu.matmul %150, %69, %cst_89 {dimension_numbers = #tpu.dot_dimension_numbers<[1], [0], [0], [1], [0, 0, 1, 1], [], []>} : vector<2x32xf32>, vector<32x96xf32>, vector<2x96xf32> -> vector<2x96xf32>
    %162 = vector.broadcast %71 : vector<1x96xf32> to vector<2x96xf32>
    %163 = arith.addf %161, %162 : vector<2x96xf32>
    %164 = vector.extract_strided_slice %160 {offsets = [0, 0], sizes = [2, 32], strides = [1, 1]} : vector<2x96xf32> to vector<2x32xf32>
    %165 = vector.extract_strided_slice %163 {offsets = [0, 0], sizes = [2, 32], strides = [1, 1]} : vector<2x96xf32> to vector<2x32xf32>
    %166 = arith.addf %164, %165 : vector<2x32xf32>
    %cst_90 = arith.constant 0.000000e+00 : f32
    %167 = vector.broadcast %cst_90 : f32 to vector<2x32xf32>
    %168 = arith.subf %167, %166 : vector<2x32xf32>
    %169 = math.exp %168 : vector<2x32xf32>
    %cst_91 = arith.constant 1.000000e+00 : f32
    %170 = vector.broadcast %cst_91 : f32 to vector<2x32xf32>
    %171 = arith.addf %170, %169 : vector<2x32xf32>
    %172 = tpu.reciprocal %171 {approx = true} : vector<2x32xf32> -> vector<2x32xf32>
    %173 = vector.extract_strided_slice %160 {offsets = [0, 32], sizes = [2, 32], strides = [1, 1]} : vector<2x96xf32> to vector<2x32xf32>
    %174 = vector.extract_strided_slice %163 {offsets = [0, 32], sizes = [2, 32], strides = [1, 1]} : vector<2x96xf32> to vector<2x32xf32>
    %175 = arith.addf %173, %174 : vector<2x32xf32>
    %cst_92 = arith.constant 0.000000e+00 : f32
    %176 = vector.broadcast %cst_92 : f32 to vector<2x32xf32>
    %177 = arith.subf %176, %175 : vector<2x32xf32>
    %178 = math.exp %177 : vector<2x32xf32>
    %cst_93 = arith.constant 1.000000e+00 : f32
    %179 = vector.broadcast %cst_93 : f32 to vector<2x32xf32>
    %180 = arith.addf %179, %178 : vector<2x32xf32>
    %181 = tpu.reciprocal %180 {approx = true} : vector<2x32xf32> -> vector<2x32xf32>
    %182 = vector.extract_strided_slice %160 {offsets = [0, 64], sizes = [2, 32], strides = [1, 1]} : vector<2x96xf32> to vector<2x32xf32>
    %183 = vector.extract_strided_slice %163 {offsets = [0, 64], sizes = [2, 32], strides = [1, 1]} : vector<2x96xf32> to vector<2x32xf32>
    %184 = arith.mulf %172, %183 : vector<2x32xf32>
    %185 = arith.addf %182, %184 : vector<2x32xf32>
    %186 = math.tanh %185 : vector<2x32xf32>
    %cst_94 = arith.constant 1.000000e+00 : f32
    %187 = vector.broadcast %cst_94 : f32 to vector<2x32xf32>
    %188 = arith.subf %187, %181 : vector<2x32xf32>
    %189 = arith.mulf %188, %186 : vector<2x32xf32>
    %190 = arith.mulf %181, %150 : vector<2x32xf32>
    %191 = arith.addf %189, %190 : vector<2x32xf32>
    %c0_95 = arith.constant 0 : index
    %192 = arith.index_cast %157 : i32 to index
    %c0_96 = arith.constant 0 : index
    %c0_97 = arith.constant 0 : index
    %193 = vector.load %arg6[%c0_95, %192, %c0_96, %c0_97] : memref<1x8x2x32xf32, #tpu.memory_space<vmem>>, vector<1x1x2x32xf32>
    %194 = vector.shape_cast %193 : vector<1x1x2x32xf32> to vector<2x32xf32>
    %195 = vector.shape_cast %191 : vector<2x32xf32> to vector<1x1x2x32xf32>
    tpu.vector_store %arg6[%c0_95, %192, %c0_96, %c0_97], %195 {strides = array<i32>} : memref<1x8x2x32xf32, #tpu.memory_space<vmem>>, vector<1x1x2x32xf32>,
    %c3_i32 = arith.constant 3 : i32
    %c0_i32_98 = arith.constant 0 : i32
    %196 = arith.cmpi eq, %arg0, %c0_i32_98 : i32
    %c7_i32_99 = arith.constant 7 : i32
    %197 = arith.subi %c7_i32_99, %c3_i32 : i32
    %198 = arith.select %196, %c3_i32, %197 : i32
    %199 = arith.index_cast %198 : i32 to index
    %c0_100 = arith.constant 0 : index
    %c0_101 = arith.constant 0 : index
    %200 = vector.load %arg7[%199, %c0_100, %c0_101] : memref<8x2x96xf32, #tpu.memory_space<vmem>>, vector<1x2x96xf32>
    %201 = vector.shape_cast %200 : vector<1x2x96xf32> to vector<2x96xf32>
    %cst_102 = arith.constant dense<0.000000e+00> : vector<2x96xf32>
    %202 = tpu.matmul %191, %69, %cst_102 {dimension_numbers = #tpu.dot_dimension_numbers<[1], [0], [0], [1], [0, 0, 1, 1], [], []>} : vector<2x32xf32>, vector<32x96xf32>, vector<2x96xf32> -> vector<2x96xf32>
    %203 = vector.broadcast %71 : vector<1x96xf32> to vector<2x96xf32>
    %204 = arith.addf %202, %203 : vector<2x96xf32>
    %205 = vector.extract_strided_slice %201 {offsets = [0, 0], sizes = [2, 32], strides = [1, 1]} : vector<2x96xf32> to vector<2x32xf32>
    %206 = vector.extract_strided_slice %204 {offsets = [0, 0], sizes = [2, 32], strides = [1, 1]} : vector<2x96xf32> to vector<2x32xf32>
    %207 = arith.addf %205, %206 : vector<2x32xf32>
    %cst_103 = arith.constant 0.000000e+00 : f32
    %208 = vector.broadcast %cst_103 : f32 to vector<2x32xf32>
    %209 = arith.subf %208, %207 : vector<2x32xf32>
    %210 = math.exp %209 : vector<2x32xf32>
    %cst_104 = arith.constant 1.000000e+00 : f32
    %211 = vector.broadcast %cst_104 : f32 to vector<2x32xf32>
    %212 = arith.addf %211, %210 : vector<2x32xf32>
    %213 = tpu.reciprocal %212 {approx = true} : vector<2x32xf32> -> vector<2x32xf32>
    %214 = vector.extract_strided_slice %201 {offsets = [0, 32], sizes = [2, 32], strides = [1, 1]} : vector<2x96xf32> to vector<2x32xf32>
    %215 = vector.extract_strided_slice %204 {offsets = [0, 32], sizes = [2, 32], strides = [1, 1]} : vector<2x96xf32> to vector<2x32xf32>
    %216 = arith.addf %214, %215 : vector<2x32xf32>
    %cst_105 = arith.constant 0.000000e+00 : f32
    %217 = vector.broadcast %cst_105 : f32 to vector<2x32xf32>
    %218 = arith.subf %217, %216 : vector<2x32xf32>
    %219 = math.exp %218 : vector<2x32xf32>
    %cst_106 = arith.constant 1.000000e+00 : f32
    %220 = vector.broadcast %cst_106 : f32 to vector<2x32xf32>
    %221 = arith.addf %220, %219 : vector<2x32xf32>
    %222 = tpu.reciprocal %221 {approx = true} : vector<2x32xf32> -> vector<2x32xf32>
    %223 = vector.extract_strided_slice %201 {offsets = [0, 64], sizes = [2, 32], strides = [1, 1]} : vector<2x96xf32> to vector<2x32xf32>
    %224 = vector.extract_strided_slice %204 {offsets = [0, 64], sizes = [2, 32], strides = [1, 1]} : vector<2x96xf32> to vector<2x32xf32>
    %225 = arith.mulf %213, %224 : vector<2x32xf32>
    %226 = arith.addf %223, %225 : vector<2x32xf32>
    %227 = math.tanh %226 : vector<2x32xf32>
    %cst_107 = arith.constant 1.000000e+00 : f32
    %228 = vector.broadcast %cst_107 : f32 to vector<2x32xf32>
    %229 = arith.subf %228, %222 : vector<2x32xf32>
    %230 = arith.mulf %229, %227 : vector<2x32xf32>
    %231 = arith.mulf %222, %191 : vector<2x32xf32>
    %232 = arith.addf %230, %231 : vector<2x32xf32>
    %c0_108 = arith.constant 0 : index
    %233 = arith.index_cast %198 : i32 to index
    %c0_109 = arith.constant 0 : index
    %c0_110 = arith.constant 0 : index
    %234 = vector.load %arg6[%c0_108, %233, %c0_109, %c0_110] : memref<1x8x2x32xf32, #tpu.memory_space<vmem>>, vector<1x1x2x32xf32>
    %235 = vector.shape_cast %234 : vector<1x1x2x32xf32> to vector<2x32xf32>
    %236 = vector.shape_cast %232 : vector<2x32xf32> to vector<1x1x2x32xf32>
    tpu.vector_store %arg6[%c0_108, %233, %c0_109, %c0_110], %236 {strides = array<i32>} : memref<1x8x2x32xf32, #tpu.memory_space<vmem>>, vector<1x1x2x32xf32>,
    %c4_i32 = arith.constant 4 : i32
    %c0_i32_111 = arith.constant 0 : i32
    %237 = arith.cmpi eq, %arg0, %c0_i32_111 : i32
    %c7_i32_112 = arith.constant 7 : i32
    %238 = arith.subi %c7_i32_112, %c4_i32 : i32
    %239 = arith.select %237, %c4_i32, %238 : i32
    %240 = arith.index_cast %239 : i32 to index
    %c0_113 = arith.constant 0 : index
    %c0_114 = arith.constant 0 : index
    %241 = vector.load %arg7[%240, %c0_113, %c0_114] : memref<8x2x96xf32, #tpu.memory_space<vmem>>, vector<1x2x96xf32>
    %242 = vector.shape_cast %241 : vector<1x2x96xf32> to vector<2x96xf32>
    %cst_115 = arith.constant dense<0.000000e+00> : vector<2x96xf32>
    %243 = tpu.matmul %232, %69, %cst_115 {dimension_numbers = #tpu.dot_dimension_numbers<[1], [0], [0], [1], [0, 0, 1, 1], [], []>} : vector<2x32xf32>, vector<32x96xf32>, vector<2x96xf32> -> vector<2x96xf32>
    %244 = vector.broadcast %71 : vector<1x96xf32> to vector<2x96xf32>
    %245 = arith.addf %243, %244 : vector<2x96xf32>
    %246 = vector.extract_strided_slice %242 {offsets = [0, 0], sizes = [2, 32], strides = [1, 1]} : vector<2x96xf32> to vector<2x32xf32>
    %247 = vector.extract_strided_slice %245 {offsets = [0, 0], sizes = [2, 32], strides = [1, 1]} : vector<2x96xf32> to vector<2x32xf32>
    %248 = arith.addf %246, %247 : vector<2x32xf32>
    %cst_116 = arith.constant 0.000000e+00 : f32
    %249 = vector.broadcast %cst_116 : f32 to vector<2x32xf32>
    %250 = arith.subf %249, %248 : vector<2x32xf32>
    %251 = math.exp %250 : vector<2x32xf32>
    %cst_117 = arith.constant 1.000000e+00 : f32
    %252 = vector.broadcast %cst_117 : f32 to vector<2x32xf32>
    %253 = arith.addf %252, %251 : vector<2x32xf32>
    %254 = tpu.reciprocal %253 {approx = true} : vector<2x32xf32> -> vector<2x32xf32>
    %255 = vector.extract_strided_slice %242 {offsets = [0, 32], sizes = [2, 32], strides = [1, 1]} : vector<2x96xf32> to vector<2x32xf32>
    %256 = vector.extract_strided_slice %245 {offsets = [0, 32], sizes = [2, 32], strides = [1, 1]} : vector<2x96xf32> to vector<2x32xf32>
    %257 = arith.addf %255, %256 : vector<2x32xf32>
    %cst_118 = arith.constant 0.000000e+00 : f32
    %258 = vector.broadcast %cst_118 : f32 to vector<2x32xf32>
    %259 = arith.subf %258, %257 : vector<2x32xf32>
    %260 = math.exp %259 : vector<2x32xf32>
    %cst_119 = arith.constant 1.000000e+00 : f32
    %261 = vector.broadcast %cst_119 : f32 to vector<2x32xf32>
    %262 = arith.addf %261, %260 : vector<2x32xf32>
    %263 = tpu.reciprocal %262 {approx = true} : vector<2x32xf32> -> vector<2x32xf32>
    %264 = vector.extract_strided_slice %242 {offsets = [0, 64], sizes = [2, 32], strides = [1, 1]} : vector<2x96xf32> to vector<2x32xf32>
    %265 = vector.extract_strided_slice %245 {offsets = [0, 64], sizes = [2, 32], strides = [1, 1]} : vector<2x96xf32> to vector<2x32xf32>
    %266 = arith.mulf %254, %265 : vector<2x32xf32>
    %267 = arith.addf %264, %266 : vector<2x32xf32>
    %268 = math.tanh %267 : vector<2x32xf32>
    %cst_120 = arith.constant 1.000000e+00 : f32
    %269 = vector.broadcast %cst_120 : f32 to vector<2x32xf32>
    %270 = arith.subf %269, %263 : vector<2x32xf32>
    %271 = arith.mulf %270, %268 : vector<2x32xf32>
    %272 = arith.mulf %263, %232 : vector<2x32xf32>
    %273 = arith.addf %271, %272 : vector<2x32xf32>
    %c0_121 = arith.constant 0 : index
    %274 = arith.index_cast %239 : i32 to index
    %c0_122 = arith.constant 0 : index
    %c0_123 = arith.constant 0 : index
    %275 = vector.load %arg6[%c0_121, %274, %c0_122, %c0_123] : memref<1x8x2x32xf32, #tpu.memory_space<vmem>>, vector<1x1x2x32xf32>
    %276 = vector.shape_cast %275 : vector<1x1x2x32xf32> to vector<2x32xf32>
    %277 = vector.shape_cast %273 : vector<2x32xf32> to vector<1x1x2x32xf32>
    tpu.vector_store %arg6[%c0_121, %274, %c0_122, %c0_123], %277 {strides = array<i32>} : memref<1x8x2x32xf32, #tpu.memory_space<vmem>>, vector<1x1x2x32xf32>,
    %c5_i32 = arith.constant 5 : i32
    %c0_i32_124 = arith.constant 0 : i32
    %278 = arith.cmpi eq, %arg0, %c0_i32_124 : i32
    %c7_i32_125 = arith.constant 7 : i32
    %279 = arith.subi %c7_i32_125, %c5_i32 : i32
    %280 = arith.select %278, %c5_i32, %279 : i32
    %281 = arith.index_cast %280 : i32 to index
    %c0_126 = arith.constant 0 : index
    %c0_127 = arith.constant 0 : index
    %282 = vector.load %arg7[%281, %c0_126, %c0_127] : memref<8x2x96xf32, #tpu.memory_space<vmem>>, vector<1x2x96xf32>
    %283 = vector.shape_cast %282 : vector<1x2x96xf32> to vector<2x96xf32>
    %cst_128 = arith.constant dense<0.000000e+00> : vector<2x96xf32>
    %284 = tpu.matmul %273, %69, %cst_128 {dimension_numbers = #tpu.dot_dimension_numbers<[1], [0], [0], [1], [0, 0, 1, 1], [], []>} : vector<2x32xf32>, vector<32x96xf32>, vector<2x96xf32> -> vector<2x96xf32>
    %285 = vector.broadcast %71 : vector<1x96xf32> to vector<2x96xf32>
    %286 = arith.addf %284, %285 : vector<2x96xf32>
    %287 = vector.extract_strided_slice %283 {offsets = [0, 0], sizes = [2, 32], strides = [1, 1]} : vector<2x96xf32> to vector<2x32xf32>
    %288 = vector.extract_strided_slice %286 {offsets = [0, 0], sizes = [2, 32], strides = [1, 1]} : vector<2x96xf32> to vector<2x32xf32>
    %289 = arith.addf %287, %288 : vector<2x32xf32>
    %cst_129 = arith.constant 0.000000e+00 : f32
    %290 = vector.broadcast %cst_129 : f32 to vector<2x32xf32>
    %291 = arith.subf %290, %289 : vector<2x32xf32>
    %292 = math.exp %291 : vector<2x32xf32>
    %cst_130 = arith.constant 1.000000e+00 : f32
    %293 = vector.broadcast %cst_130 : f32 to vector<2x32xf32>
    %294 = arith.addf %293, %292 : vector<2x32xf32>
    %295 = tpu.reciprocal %294 {approx = true} : vector<2x32xf32> -> vector<2x32xf32>
    %296 = vector.extract_strided_slice %283 {offsets = [0, 32], sizes = [2, 32], strides = [1, 1]} : vector<2x96xf32> to vector<2x32xf32>
    %297 = vector.extract_strided_slice %286 {offsets = [0, 32], sizes = [2, 32], strides = [1, 1]} : vector<2x96xf32> to vector<2x32xf32>
    %298 = arith.addf %296, %297 : vector<2x32xf32>
    %cst_131 = arith.constant 0.000000e+00 : f32
    %299 = vector.broadcast %cst_131 : f32 to vector<2x32xf32>
    %300 = arith.subf %299, %298 : vector<2x32xf32>
    %301 = math.exp %300 : vector<2x32xf32>
    %cst_132 = arith.constant 1.000000e+00 : f32
    %302 = vector.broadcast %cst_132 : f32 to vector<2x32xf32>
    %303 = arith.addf %302, %301 : vector<2x32xf32>
    %304 = tpu.reciprocal %303 {approx = true} : vector<2x32xf32> -> vector<2x32xf32>
    %305 = vector.extract_strided_slice %283 {offsets = [0, 64], sizes = [2, 32], strides = [1, 1]} : vector<2x96xf32> to vector<2x32xf32>
    %306 = vector.extract_strided_slice %286 {offsets = [0, 64], sizes = [2, 32], strides = [1, 1]} : vector<2x96xf32> to vector<2x32xf32>
    %307 = arith.mulf %295, %306 : vector<2x32xf32>
    %308 = arith.addf %305, %307 : vector<2x32xf32>
    %309 = math.tanh %308 : vector<2x32xf32>
    %cst_133 = arith.constant 1.000000e+00 : f32
    %310 = vector.broadcast %cst_133 : f32 to vector<2x32xf32>
    %311 = arith.subf %310, %304 : vector<2x32xf32>
    %312 = arith.mulf %311, %309 : vector<2x32xf32>
    %313 = arith.mulf %304, %273 : vector<2x32xf32>
    %314 = arith.addf %312, %313 : vector<2x32xf32>
    %c0_134 = arith.constant 0 : index
    %315 = arith.index_cast %280 : i32 to index
    %c0_135 = arith.constant 0 : index
    %c0_136 = arith.constant 0 : index
    %316 = vector.load %arg6[%c0_134, %315, %c0_135, %c0_136] : memref<1x8x2x32xf32, #tpu.memory_space<vmem>>, vector<1x1x2x32xf32>
    %317 = vector.shape_cast %316 : vector<1x1x2x32xf32> to vector<2x32xf32>
    %318 = vector.shape_cast %314 : vector<2x32xf32> to vector<1x1x2x32xf32>
    tpu.vector_store %arg6[%c0_134, %315, %c0_135, %c0_136], %318 {strides = array<i32>} : memref<1x8x2x32xf32, #tpu.memory_space<vmem>>, vector<1x1x2x32xf32>,
    %c6_i32 = arith.constant 6 : i32
    %c0_i32_137 = arith.constant 0 : i32
    %319 = arith.cmpi eq, %arg0, %c0_i32_137 : i32
    %c7_i32_138 = arith.constant 7 : i32
    %320 = arith.subi %c7_i32_138, %c6_i32 : i32
    %321 = arith.select %319, %c6_i32, %320 : i32
    %322 = arith.index_cast %321 : i32 to index
    %c0_139 = arith.constant 0 : index
    %c0_140 = arith.constant 0 : index
    %323 = vector.load %arg7[%322, %c0_139, %c0_140] : memref<8x2x96xf32, #tpu.memory_space<vmem>>, vector<1x2x96xf32>
    %324 = vector.shape_cast %323 : vector<1x2x96xf32> to vector<2x96xf32>
    %cst_141 = arith.constant dense<0.000000e+00> : vector<2x96xf32>
    %325 = tpu.matmul %314, %69, %cst_141 {dimension_numbers = #tpu.dot_dimension_numbers<[1], [0], [0], [1], [0, 0, 1, 1], [], []>} : vector<2x32xf32>, vector<32x96xf32>, vector<2x96xf32> -> vector<2x96xf32>
    %326 = vector.broadcast %71 : vector<1x96xf32> to vector<2x96xf32>
    %327 = arith.addf %325, %326 : vector<2x96xf32>
    %328 = vector.extract_strided_slice %324 {offsets = [0, 0], sizes = [2, 32], strides = [1, 1]} : vector<2x96xf32> to vector<2x32xf32>
    %329 = vector.extract_strided_slice %327 {offsets = [0, 0], sizes = [2, 32], strides = [1, 1]} : vector<2x96xf32> to vector<2x32xf32>
    %330 = arith.addf %328, %329 : vector<2x32xf32>
    %cst_142 = arith.constant 0.000000e+00 : f32
    %331 = vector.broadcast %cst_142 : f32 to vector<2x32xf32>
    %332 = arith.subf %331, %330 : vector<2x32xf32>
    %333 = math.exp %332 : vector<2x32xf32>
    %cst_143 = arith.constant 1.000000e+00 : f32
    %334 = vector.broadcast %cst_143 : f32 to vector<2x32xf32>
    %335 = arith.addf %334, %333 : vector<2x32xf32>
    %336 = tpu.reciprocal %335 {approx = true} : vector<2x32xf32> -> vector<2x32xf32>
    %337 = vector.extract_strided_slice %324 {offsets = [0, 32], sizes = [2, 32], strides = [1, 1]} : vector<2x96xf32> to vector<2x32xf32>
    %338 = vector.extract_strided_slice %327 {offsets = [0, 32], sizes = [2, 32], strides = [1, 1]} : vector<2x96xf32> to vector<2x32xf32>
    %339 = arith.addf %337, %338 : vector<2x32xf32>
    %cst_144 = arith.constant 0.000000e+00 : f32
    %340 = vector.broadcast %cst_144 : f32 to vector<2x32xf32>
    %341 = arith.subf %340, %339 : vector<2x32xf32>
    %342 = math.exp %341 : vector<2x32xf32>
    %cst_145 = arith.constant 1.000000e+00 : f32
    %343 = vector.broadcast %cst_145 : f32 to vector<2x32xf32>
    %344 = arith.addf %343, %342 : vector<2x32xf32>
    %345 = tpu.reciprocal %344 {approx = true} : vector<2x32xf32> -> vector<2x32xf32>
    %346 = vector.extract_strided_slice %324 {offsets = [0, 64], sizes = [2, 32], strides = [1, 1]} : vector<2x96xf32> to vector<2x32xf32>
    %347 = vector.extract_strided_slice %327 {offsets = [0, 64], sizes = [2, 32], strides = [1, 1]} : vector<2x96xf32> to vector<2x32xf32>
    %348 = arith.mulf %336, %347 : vector<2x32xf32>
    %349 = arith.addf %346, %348 : vector<2x32xf32>
    %350 = math.tanh %349 : vector<2x32xf32>
    %cst_146 = arith.constant 1.000000e+00 : f32
    %351 = vector.broadcast %cst_146 : f32 to vector<2x32xf32>
    %352 = arith.subf %351, %345 : vector<2x32xf32>
    %353 = arith.mulf %352, %350 : vector<2x32xf32>
    %354 = arith.mulf %345, %314 : vector<2x32xf32>
    %355 = arith.addf %353, %354 : vector<2x32xf32>
    %c0_147 = arith.constant 0 : index
    %356 = arith.index_cast %321 : i32 to index
    %c0_148 = arith.constant 0 : index
    %c0_149 = arith.constant 0 : index
    %357 = vector.load %arg6[%c0_147, %356, %c0_148, %c0_149] : memref<1x8x2x32xf32, #tpu.memory_space<vmem>>, vector<1x1x2x32xf32>
    %358 = vector.shape_cast %357 : vector<1x1x2x32xf32> to vector<2x32xf32>
    %359 = vector.shape_cast %355 : vector<2x32xf32> to vector<1x1x2x32xf32>
    tpu.vector_store %arg6[%c0_147, %356, %c0_148, %c0_149], %359 {strides = array<i32>} : memref<1x8x2x32xf32, #tpu.memory_space<vmem>>, vector<1x1x2x32xf32>,
    %c7_i32_150 = arith.constant 7 : i32
    %c0_i32_151 = arith.constant 0 : i32
    %360 = arith.cmpi eq, %arg0, %c0_i32_151 : i32
    %c7_i32_152 = arith.constant 7 : i32
    %361 = arith.subi %c7_i32_152, %c7_i32_150 : i32
    %362 = arith.select %360, %c7_i32_150, %361 : i32
    %363 = arith.index_cast %362 : i32 to index
    %c0_153 = arith.constant 0 : index
    %c0_154 = arith.constant 0 : index
    %364 = vector.load %arg7[%363, %c0_153, %c0_154] : memref<8x2x96xf32, #tpu.memory_space<vmem>>, vector<1x2x96xf32>
    %365 = vector.shape_cast %364 : vector<1x2x96xf32> to vector<2x96xf32>
    %cst_155 = arith.constant dense<0.000000e+00> : vector<2x96xf32>
    %366 = tpu.matmul %355, %69, %cst_155 {dimension_numbers = #tpu.dot_dimension_numbers<[1], [0], [0], [1], [0, 0, 1, 1], [], []>} : vector<2x32xf32>, vector<32x96xf32>, vector<2x96xf32> -> vector<2x96xf32>
    %367 = vector.broadcast %71 : vector<1x96xf32> to vector<2x96xf32>
    %368 = arith.addf %366, %367 : vector<2x96xf32>
    %369 = vector.extract_strided_slice %365 {offsets = [0, 0], sizes = [2, 32], strides = [1, 1]} : vector<2x96xf32> to vector<2x32xf32>
    %370 = vector.extract_strided_slice %368 {offsets = [0, 0], sizes = [2, 32], strides = [1, 1]} : vector<2x96xf32> to vector<2x32xf32>
    %371 = arith.addf %369, %370 : vector<2x32xf32>
    %cst_156 = arith.constant 0.000000e+00 : f32
    %372 = vector.broadcast %cst_156 : f32 to vector<2x32xf32>
    %373 = arith.subf %372, %371 : vector<2x32xf32>
    %374 = math.exp %373 : vector<2x32xf32>
    %cst_157 = arith.constant 1.000000e+00 : f32
    %375 = vector.broadcast %cst_157 : f32 to vector<2x32xf32>
    %376 = arith.addf %375, %374 : vector<2x32xf32>
    %377 = tpu.reciprocal %376 {approx = true} : vector<2x32xf32> -> vector<2x32xf32>
    %378 = vector.extract_strided_slice %365 {offsets = [0, 32], sizes = [2, 32], strides = [1, 1]} : vector<2x96xf32> to vector<2x32xf32>
    %379 = vector.extract_strided_slice %368 {offsets = [0, 32], sizes = [2, 32], strides = [1, 1]} : vector<2x96xf32> to vector<2x32xf32>
    %380 = arith.addf %378, %379 : vector<2x32xf32>
    %cst_158 = arith.constant 0.000000e+00 : f32
    %381 = vector.broadcast %cst_158 : f32 to vector<2x32xf32>
    %382 = arith.subf %381, %380 : vector<2x32xf32>
    %383 = math.exp %382 : vector<2x32xf32>
    %cst_159 = arith.constant 1.000000e+00 : f32
    %384 = vector.broadcast %cst_159 : f32 to vector<2x32xf32>
    %385 = arith.addf %384, %383 : vector<2x32xf32>
    %386 = tpu.reciprocal %385 {approx = true} : vector<2x32xf32> -> vector<2x32xf32>
    %387 = vector.extract_strided_slice %365 {offsets = [0, 64], sizes = [2, 32], strides = [1, 1]} : vector<2x96xf32> to vector<2x32xf32>
    %388 = vector.extract_strided_slice %368 {offsets = [0, 64], sizes = [2, 32], strides = [1, 1]} : vector<2x96xf32> to vector<2x32xf32>
    %389 = arith.mulf %377, %388 : vector<2x32xf32>
    %390 = arith.addf %387, %389 : vector<2x32xf32>
    %391 = math.tanh %390 : vector<2x32xf32>
    %cst_160 = arith.constant 1.000000e+00 : f32
    %392 = vector.broadcast %cst_160 : f32 to vector<2x32xf32>
    %393 = arith.subf %392, %386 : vector<2x32xf32>
    %394 = arith.mulf %393, %391 : vector<2x32xf32>
    %395 = arith.mulf %386, %355 : vector<2x32xf32>
    %396 = arith.addf %394, %395 : vector<2x32xf32>
    %c0_161 = arith.constant 0 : index
    %397 = arith.index_cast %362 : i32 to index
    %c0_162 = arith.constant 0 : index
    %c0_163 = arith.constant 0 : index
    %398 = vector.load %arg6[%c0_161, %397, %c0_162, %c0_163] : memref<1x8x2x32xf32, #tpu.memory_space<vmem>>, vector<1x1x2x32xf32>
    %399 = vector.shape_cast %398 : vector<1x1x2x32xf32> to vector<2x32xf32>
    %400 = vector.shape_cast %396 : vector<2x32xf32> to vector<1x1x2x32xf32>
    tpu.vector_store %arg6[%c0_161, %397, %c0_162, %c0_163], %400 {strides = array<i32>} : memref<1x8x2x32xf32, #tpu.memory_space<vmem>>, vector<1x1x2x32xf32>,
    %c8_i32 = arith.constant 8 : i32
    return
  }
  func.func @transform_0(%arg0: i32) -> (i32, i32, i32) {
    %c0_i32 = arith.constant 0 : i32
    %c0_i32_0 = arith.constant 0 : i32
    %c0_i32_1 = arith.constant 0 : i32
    %c0_i32_2 = arith.constant 0 : i32
    return %c0_i32, %c0_i32_0, %c0_i32_1 : i32, i32, i32
  }
  func.func @transform_1(%arg0: i32) -> (i32, i32, i32) {
    %c0_i32 = arith.constant 0 : i32
    %c0_i32_0 = arith.constant 0 : i32
    %c0_i32_1 = arith.constant 0 : i32
    return %arg0, %c0_i32, %c0_i32_0 : i32, i32, i32
  }
  func.func @transform_2(%arg0: i32) -> (i32, i32, i32) {
    %c0_i32 = arith.constant 0 : i32
    %c0_i32_0 = arith.constant 0 : i32
    %c0_i32_1 = arith.constant 0 : i32
    return %arg0, %c0_i32, %c0_i32_0 : i32, i32, i32
  }
  func.func @transform_3(%arg0: i32) -> (i32, i32, i32) {
    %c0_i32 = arith.constant 0 : i32
    %c0_i32_0 = arith.constant 0 : i32
    %c0_i32_1 = arith.constant 0 : i32
    return %arg0, %c0_i32, %c0_i32_0 : i32, i32, i32
  }
  func.func @transform_4(%arg0: i32) -> (i32, i32, i32) {
    %c0_i32 = arith.constant 0 : i32
    %c0_i32_0 = arith.constant 0 : i32
    %c0_i32_1 = arith.constant 0 : i32
    return %arg0, %c0_i32, %c0_i32_0 : i32, i32, i32
  }
  func.func @transform_5(%arg0: i32) -> (i32, i32, i32, i32) {
    %c0_i32 = arith.constant 0 : i32
    %c0_i32_0 = arith.constant 0 : i32
    %c0_i32_1 = arith.constant 0 : i32
    %c0_i32_2 = arith.constant 0 : i32
    return %arg0, %c0_i32, %c0_i32_0, %c0_i32_1 : i32, i32, i32, i32
  }
}

module attributes {stable_mosaic.version = 11 : i64} {
  func.func @_linear_act_kernel(%arg0: memref<16x64xf32, #tpu.memory_space<vmem>>, %arg1: memref<64x28xf32, #tpu.memory_space<vmem>>, %arg2: memref<1x28xf32, #tpu.memory_space<vmem>>, %arg3: memref<16x28xf32, #tpu.memory_space<vmem>>) attributes {dimension_semantics = [], scalar_prefetch = 0 : i64, scratch_operands = 0 : i64, tpu.core_type = #tpu.core_type<tc>} {
    %c0 = arith.constant 0 : index
    %c0_0 = arith.constant 0 : index
    %0 = vector.load %arg0[%c0, %c0_0] : memref<16x64xf32, #tpu.memory_space<vmem>>, vector<16x64xf32>
    %c0_1 = arith.constant 0 : index
    %c0_2 = arith.constant 0 : index
    %1 = vector.load %arg1[%c0_1, %c0_2] : memref<64x28xf32, #tpu.memory_space<vmem>>, vector<64x28xf32>
    %cst = arith.constant dense<0.000000e+00> : vector<16x28xf32>
    %2 = tpu.matmul %0, %1, %cst {dimension_numbers = #tpu.dot_dimension_numbers<[1], [0], [0], [1], [0, 0, 1, 1], [], []>} : vector<16x64xf32>, vector<64x28xf32>, vector<16x28xf32> -> vector<16x28xf32>
    %c0_3 = arith.constant 0 : index
    %c0_4 = arith.constant 0 : index
    %3 = vector.load %arg2[%c0_3, %c0_4] : memref<1x28xf32, #tpu.memory_space<vmem>>, vector<1x28xf32>
    %4 = vector.broadcast %3 : vector<1x28xf32> to vector<16x28xf32>
    %5 = arith.addf %2, %4 : vector<16x28xf32>
    %cst_5 = arith.constant dense<0xFF800000> : vector<16xf32>
    %6 = vector.multi_reduction <maximumf>, %5, %cst_5 [1] : vector<16x28xf32> to vector<16xf32>
    %7 = vector.shape_cast %6 : vector<16xf32> to vector<16x1xf32>
    %8 = vector.broadcast %7 : vector<16x1xf32> to vector<16x28xf32>
    %9 = arith.subf %5, %8 : vector<16x28xf32>
    %10 = math.exp %9 : vector<16x28xf32>
    %cst_6 = arith.constant dense<0.000000e+00> : vector<16xf32>
    %11 = vector.multi_reduction <add>, %10, %cst_6 [1] : vector<16x28xf32> to vector<16xf32>
    %12 = vector.shape_cast %11 : vector<16xf32> to vector<16x1xf32>
    %13 = math.log %12 : vector<16x1xf32>
    %14 = vector.broadcast %13 : vector<16x1xf32> to vector<16x28xf32>
    %15 = arith.subf %9, %14 : vector<16x28xf32>
    %c0_7 = arith.constant 0 : index
    %c0_8 = arith.constant 0 : index
    %16 = vector.load %arg3[%c0_7, %c0_8] : memref<16x28xf32, #tpu.memory_space<vmem>>, vector<16x28xf32>
    tpu.vector_store %arg3[%c0_7, %c0_8], %15 {strides = array<i32>} : memref<16x28xf32, #tpu.memory_space<vmem>>, vector<16x28xf32>,
    return
  }
}

module attributes {stable_mosaic.version = 11 : i64} {
  func.func @_ctc_kernel(%arg0: memref<8x2x128xf32, #tpu.memory_space<vmem>>, %arg1: memref<2x128xf32, #tpu.memory_space<vmem>>, %arg2: memref<2x128xf32, #tpu.memory_space<vmem>>, %arg3: memref<2x128xf32, #tpu.memory_space<vmem>>, %arg4: memref<2x1xi32, #tpu.memory_space<vmem>>, %arg5: memref<2x1xf32, #tpu.memory_space<vmem>>) attributes {dimension_semantics = [], scalar_prefetch = 0 : i64, scratch_operands = 0 : i64, tpu.core_type = #tpu.core_type<tc>} {
    %c0 = arith.constant 0 : index
    %c0_0 = arith.constant 0 : index
    %0 = vector.load %arg1[%c0, %c0_0] : memref<2x128xf32, #tpu.memory_space<vmem>>, vector<2x128xf32>
    %cst = arith.constant 5.000000e-01 : f32
    %1 = vector.broadcast %cst : f32 to vector<2x128xf32>
    %2 = arith.cmpf ogt, %0, %1 : vector<2x128xf32>
    %c0_1 = arith.constant 0 : index
    %c0_2 = arith.constant 0 : index
    %3 = vector.load %arg2[%c0_1, %c0_2] : memref<2x128xf32, #tpu.memory_space<vmem>>, vector<2x128xf32>
    %cst_3 = arith.constant 5.000000e-01 : f32
    %4 = vector.broadcast %cst_3 : f32 to vector<2x128xf32>
    %5 = arith.cmpf ogt, %3, %4 : vector<2x128xf32>
    %c0_4 = arith.constant 0 : index
    %c0_5 = arith.constant 0 : index
    %6 = vector.load %arg3[%c0_4, %c0_5] : memref<2x128xf32, #tpu.memory_space<vmem>>, vector<2x128xf32>
    %cst_6 = arith.constant 5.000000e-01 : f32
    %7 = vector.broadcast %cst_6 : f32 to vector<2x128xf32>
    %8 = arith.cmpf ogt, %6, %7 : vector<2x128xf32>
    %c0_7 = arith.constant 0 : index
    %c0_8 = arith.constant 0 : index
    %9 = vector.load %arg4[%c0_7, %c0_8] : memref<2x1xi32, #tpu.memory_space<vmem>>, vector<2x1xi32>
    %10 = tpu.iota {dimensions = array<i32: 1>} : vector<2x128xi32>
    %c1_i32 = arith.constant 1 : i32
    %11 = vector.broadcast %c1_i32 : i32 to vector<2x128xi32>
    %12 = arith.cmpi sle, %10, %11 : vector<2x128xi32>
    %13 = arith.andi %12, %5 : vector<2x128xi1>
    %c0_9 = arith.constant 0 : index
    %c0_10 = arith.constant 0 : index
    %c0_11 = arith.constant 0 : index
    %14 = vector.load %arg0[%c0_9, %c0_10, %c0_11] : memref<8x2x128xf32, #tpu.memory_space<vmem>>, vector<1x2x128xf32>
    %15 = vector.shape_cast %14 : vector<1x2x128xf32> to vector<2x128xf32>
    %cst_12 = arith.constant -1.000000e+30 : f32
    %16 = vector.broadcast %cst_12 : f32 to vector<2x128xf32>
    %17 = arith.select %13, %15, %16 : vector<2x128xi1>, vector<2x128xf32>
    %c1_i32_13 = arith.constant 1 : i32
    %c7_i32 = arith.constant 7 : i32
    %18 = arith.addi %c1_i32_13, %c7_i32 : i32
    %c1_i32_14 = arith.constant 1 : i32
    %19 = scf.for %arg6 = %c1_i32_13 to %18 step %c1_i32_14 iter_args(%arg7 = %17) -> (vector<2x128xf32>)  : i32 {
      %c1_i32_23 = arith.constant 1 : i32
      %36 = vector.broadcast %c1_i32_23 : i32 to vector<2x128xi32>
      %37 = arith.cmpi sge, %10, %36 : vector<2x128xi32>
      %c1_i32_24 = arith.constant 1 : i32
      %38 = tpu.dynamic_rotate %arg7 by %c1_i32_24 dim 1 : vector<2x128xf32>, i32 -> vector<2x128xf32>
      %cst_25 = arith.constant -1.000000e+30 : f32
      %39 = vector.broadcast %cst_25 : f32 to vector<2x128xf32>
      %40 = arith.select %37, %38, %39 : vector<2x128xi1>, vector<2x128xf32>
      %c2_i32 = arith.constant 2 : i32
      %41 = tpu.dynamic_rotate %arg7 by %c2_i32 dim 1 : vector<2x128xf32>, i32 -> vector<2x128xf32>
      %cst_26 = arith.constant -1.000000e+30 : f32
      %42 = vector.broadcast %cst_26 : f32 to vector<2x128xf32>
      %43 = arith.select %2, %41, %42 : vector<2x128xi1>, vector<2x128xf32>
      %44 = arith.maximumf %arg7, %40 : vector<2x128xf32>
      %45 = arith.maximumf %44, %43 : vector<2x128xf32>
      %46 = arith.subf %arg7, %45 : vector<2x128xf32>
      %47 = math.exp %46 : vector<2x128xf32>
      %48 = arith.subf %40, %45 : vector<2x128xf32>
      %49 = math.exp %48 : vector<2x128xf32>
      %50 = arith.addf %47, %49 : vector<2x128xf32>
      %51 = arith.subf %43, %45 : vector<2x128xf32>
      %52 = math.exp %51 : vector<2x128xf32>
      %53 = arith.addf %50, %52 : vector<2x128xf32>
      %54 = math.log %53 : vector<2x128xf32>
      %55 = arith.addf %45, %54 : vector<2x128xf32>
      %56 = arith.index_cast %arg6 : i32 to index
      %c0_27 = arith.constant 0 : index
      %c0_28 = arith.constant 0 : index
      %57 = vector.load %arg0[%56, %c0_27, %c0_28] : memref<8x2x128xf32, #tpu.memory_space<vmem>>, vector<1x2x128xf32>
      %58 = vector.shape_cast %57 : vector<1x2x128xf32> to vector<2x128xf32>
      %59 = arith.addf %55, %58 : vector<2x128xf32>
      %cst_29 = arith.constant -1.000000e+30 : f32
      %60 = vector.broadcast %cst_29 : f32 to vector<2x128xf32>
      %61 = arith.select %5, %59, %60 : vector<2x128xi1>, vector<2x128xf32>
      %62 = vector.broadcast %arg6 : i32 to vector<2x1xi32>
      %63 = arith.cmpi slt, %62, %9 : vector<2x1xi32>
      %64 = vector.shape_cast %63 : vector<2x1xi1> to vector<2x1xi1>
      %65 = vector.broadcast %64 : vector<2x1xi1> to vector<2x128xi1>
      %66 = arith.select %65, %61, %arg7 : vector<2x128xi1>, vector<2x128xf32>
      scf.yield %66 : vector<2x128xf32>
    }
    %c7_i32_15 = arith.constant 7 : i32
    %cst_16 = arith.constant -1.000000e+30 : f32
    %20 = vector.broadcast %cst_16 : f32 to vector<2x128xf32>
    %21 = arith.select %8, %19, %20 : vector<2x128xi1>, vector<2x128xf32>
    %cst_17 = arith.constant dense<0xFF800000> : vector<2xf32>
    %22 = vector.multi_reduction <maximumf>, %21, %cst_17 [1] : vector<2x128xf32> to vector<2xf32>
    %23 = vector.shape_cast %22 : vector<2xf32> to vector<2x1xf32>
    %24 = vector.broadcast %23 : vector<2x1xf32> to vector<2x128xf32>
    %25 = arith.subf %19, %24 : vector<2x128xf32>
    %26 = math.exp %25 : vector<2x128xf32>
    %cst_18 = arith.constant 0.000000e+00 : f32
    %27 = vector.broadcast %cst_18 : f32 to vector<2x128xf32>
    %28 = arith.select %8, %26, %27 : vector<2x128xi1>, vector<2x128xf32>
    %cst_19 = arith.constant dense<0.000000e+00> : vector<2xf32>
    %29 = vector.multi_reduction <add>, %28, %cst_19 [1] : vector<2x128xf32> to vector<2xf32>
    %30 = vector.shape_cast %29 : vector<2xf32> to vector<2x1xf32>
    %31 = math.log %30 : vector<2x1xf32>
    %32 = arith.addf %23, %31 : vector<2x1xf32>
    %cst_20 = arith.constant 0.000000e+00 : f32
    %33 = vector.broadcast %cst_20 : f32 to vector<2x1xf32>
    %34 = arith.subf %33, %32 : vector<2x1xf32>
    %c0_21 = arith.constant 0 : index
    %c0_22 = arith.constant 0 : index
    %35 = vector.load %arg5[%c0_21, %c0_22] : memref<2x1xf32, #tpu.memory_space<vmem>>, vector<2x1xf32>
    tpu.vector_store %arg5[%c0_21, %c0_22], %34 {strides = array<i32>} : memref<2x1xf32, #tpu.memory_space<vmem>>, vector<2x1xf32>,
    return
  }
}

</mosaic_0001>

<bundles_post_ra>
// kernel: meta_learner_forward.4
= control target key start
LH: loop header
LB: loop body
LE: loop exit
PB: predicated region body
PF: predicated region fallthrough
CT: control target
= control target key end

     0   :  { %s821_s12 = smov 0   ;;  %s823_s13 = smov 0   ;;  %s1013_s0 = inlined_call_operand.vmem [shape: bf16[8,128], index: 0, kind: input, shape index: {}]   ;;  %s1014_s1 = inlined_call_operand.vmem [shape: bf16[128,1024], index: 1, kind: input, shape index: {}]   ;;  %s1015_s2 = inlined_call_operand.vmem [shape: f32[8,1], index: 2, kind: input, shape index: {}]   ;;  %s1016_s3 = inlined_call_operand.vmem [shape: f32[8,1024], index: 3, kind: output, shape index: {}]  }
   0x1   :  { %s825_s14 = smov 0  }
   0x2 LB: > { %s576_s15 = sadd.s32 4294967295, %s798_s14   ;;  %s838_s16 = sadd.s32 1, %s798_s14   ;;  %s798_s14 = sphi %s825_s14, %s1019_s14   ;;  %s794_s13 = sphi %s823_s13, %s1018_s13   ;;  %s790_s12 = sphi %s821_s12, %s1017_s12  }
   0x3   : > { %s38_s17 = ssub.s32 %s798_s14, %s838_s16  ;;  %s41_s18 = sadd.s32 1, %s794_s13 }
   0x4   : > { %p39_p0 = scmp.eq.s32.totalorder %s38_s17, 0  ;;  %p48_p1 = scmp.ne.s32.totalorder %s794_s13, %s790_s12 }
   0x5   : > { %p49_p2 = scmp.eq.s32.totalorder %s798_s14, 0  ;;  %p579_p4 = scmp.ge.s32.totalorder %s798_s14, 2 }
   0x6   : > { %s847_s19 = scalar_select %p39_p0, %s794_s13, %s41_s18  }
   0x7   : > { %p50_p3 = por %p49_p2, %p48_p1  ;;  %127 = sbr.rel (%p579_p4) target bundleno = 48 (0x30), region = 24 }
   0xc   : > { %130 = sbr.rel (!%p50_p3) target bundleno = 48 (0x30), region = 28  ;;  %s132_s20 = sand.u32 (%p50_p3), 1, %s794_s13  }
   0xd   : > { %s717_s21 = sshll.u32 (%p50_p3), %s798_s14, 4  ;;  %s580_s22 = sshll.u32 (%p50_p3), %s132_s20, 8 }
   0xe   : > { %s855_s25 = scalar_lea.vmem (%p50_p3), %s1014_s1, %s717_s21  ;;  %s860_s26 = scalar_lea.vmem (%p50_p3), [#allocation2], %s580_s22 }
   0xf   : > { %v150_v0 = vld [vmem:[%s855_s25] sm:$0xff] (%p50_p3)  ;;  %v152_v1 = vld [vmem:[%s855_s25 + $0x8] sm:$0xff] (%p50_p3) }
  0x10   : > { %v154_v2 = vld [vmem:[%s855_s25 + $0x20] sm:$0xff] (%p50_p3)  ;;  %151 = vst [vmem:[%s860_s26] sm:$0xff] (%p50_p3), %v150_v0  ;;  %v156_v3 = vld [vmem:[%s855_s25 + $0x28] sm:$0xff] (%p50_p3) }
  0x11   : > { %153 = vst [vmem:[%s860_s26 + $0x8] sm:$0xff] %v152_v1  ;;  %v158_v4 = vld [vmem:[%s855_s25 + $0x40] sm:$0xff]  ;;  %v160_v5 = vld [vmem:[%s855_s25 + $0x48] sm:$0xff] }
  0x12   : > { %155 = vst [vmem:[%s860_s26 + $0x10] sm:$0xff] %v154_v2  ;;  %v162_v6 = vld [vmem:[%s855_s25 + $0x60] sm:$0xff]  ;;  %v164_v7 = vld [vmem:[%s855_s25 + $0x68] sm:$0xff] }
  0x13   : > { %157 = vst [vmem:[%s860_s26 + $0x18] sm:$0xff] %v156_v3  ;;  %v166_v8 = vld [vmem:[%s855_s25 + $0x80] sm:$0xff]  ;;  %v168_v9 = vld [vmem:[%s855_s25 + $0x88] sm:$0xff] }
  0x14   : > { %159 = vst [vmem:[%s860_s26 + $0x20] sm:$0xff] %v158_v4  ;;  %v170_v10 = vld [vmem:[%s855_s25 + $0xa0] sm:$0xff]  ;;  %v172_v11 = vld [vmem:[%s855_s25 + $0xa8] sm:$0xff] }
  0x15   : > { %161 = vst [vmem:[%s860_s26 + $0x28] sm:$0xff] %v160_v5  ;;  %v174_v12 = vld [vmem:[%s855_s25 + $0xc0] sm:$0xff]  ;;  %v176_v13 = vld [vmem:[%s855_s25 + $0xc8] sm:$0xff] }
  0x16   : > { %163 = vst [vmem:[%s860_s26 + $0x30] sm:$0xff] %v162_v6  ;;  %v178_v14 = vld [vmem:[%s855_s25 + $0xe0] sm:$0xff]  ;;  %v180_v15 = vld [vmem:[%s855_s25 + $0xe8] sm:$0xff] }
  0x17   : > { %165 = vst [vmem:[%s860_s26 + $0x38] sm:$0xff] %v164_v7  ;;  %v182_v16 = vld [vmem:[%s855_s25 + $0x100] sm:$0xff]  ;;  %v184_v17 = vld [vmem:[%s855_s25 + $0x108] sm:$0xff] }
  0x18   : > { %167 = vst [vmem:[%s860_s26 + $0x40] sm:$0xff] %v166_v8  ;;  %v186_v18 = vld [vmem:[%s855_s25 + $0x120] sm:$0xff]  ;;  %v188_v19 = vld [vmem:[%s855_s25 + $0x128] sm:$0xff] }
  0x19   : > { %169 = vst [vmem:[%s860_s26 + $0x48] sm:$0xff] %v168_v9  ;;  %v190_v20 = vld [vmem:[%s855_s25 + $0x140] sm:$0xff]  ;;  %v192_v21 = vld [vmem:[%s855_s25 + $0x148] sm:$0xff] }
  0x1a   : > { %171 = vst [vmem:[%s860_s26 + $0x50] sm:$0xff] %v170_v10  ;;  %v194_v22 = vld [vmem:[%s855_s25 + $0x160] sm:$0xff]  ;;  %v196_v23 = vld [vmem:[%s855_s25 + $0x168] sm:$0xff] }
  0x1b   : > { %173 = vst [vmem:[%s860_s26 + $0x58] sm:$0xff] %v172_v11  ;;  %v198_v24 = vld [vmem:[%s855_s25 + $0x180] sm:$0xff]  ;;  %v200_v25 = vld [vmem:[%s855_s25 + $0x188] sm:$0xff] }
  0x1c   : > { %175 = vst [vmem:[%s860_s26 + $0x60] sm:$0xff] %v174_v12  ;;  %v202_v26 = vld [vmem:[%s855_s25 + $0x1a0] sm:$0xff]  ;;  %v204_v27 = vld [vmem:[%s855_s25 + $0x1a8] sm:$0xff] }
  0x1d   : > { %177 = vst [vmem:[%s860_s26 + $0x68] sm:$0xff] %v176_v13  ;;  %v206_v28 = vld [vmem:[%s855_s25 + $0x1c0] sm:$0xff]  ;;  %v208_v29 = vld [vmem:[%s855_s25 + $0x1c8] sm:$0xff] }
  0x1e   : > { %179 = vst [vmem:[%s860_s26 + $0x70] sm:$0xff] %v178_v14  ;;  %v210_v30 = vld [vmem:[%s855_s25 + $0x1e0] sm:$0xff]  ;;  %v212_v31 = vld [vmem:[%s855_s25 + $0x1e8] sm:$0xff] }
  0x1f   : > { %181 = vst [vmem:[%s860_s26 + $0x78] sm:$0xff] %v180_v15 }
  0x20   : > { %183 = vst [vmem:[%s860_s26 + $0x80] sm:$0xff] %v182_v16 }
  0x21   : > { %185 = vst [vmem:[%s860_s26 + $0x88] sm:$0xff] %v184_v17 }
  0x22   : > { %187 = vst [vmem:[%s860_s26 + $0x90] sm:$0xff] %v186_v18 }
  0x23   : > { %189 = vst [vmem:[%s860_s26 + $0x98] sm:$0xff] %v188_v19 }
  0x24   : > { %191 = vst [vmem:[%s860_s26 + $0xa0] sm:$0xff] %v190_v20 }
  0x25   : > { %193 = vst [vmem:[%s860_s26 + $0xa8] sm:$0xff] %v192_v21 }
  0x26   : > { %195 = vst [vmem:[%s860_s26 + $0xb0] sm:$0xff] %v194_v22 }
  0x27   : > { %197 = vst [vmem:[%s860_s26 + $0xb8] sm:$0xff] %v196_v23 }
  0x28   : > { %199 = vst [vmem:[%s860_s26 + $0xc0] sm:$0xff] %v198_v24 }
  0x29   : > { %201 = vst [vmem:[%s860_s26 + $0xc8] sm:$0xff] %v200_v25 }
  0x2a   : > { %203 = vst [vmem:[%s860_s26 + $0xd0] sm:$0xff] %v202_v26 }
  0x2b   : > { %205 = vst [vmem:[%s860_s26 + $0xd8] sm:$0xff] %v204_v27 }
  0x2c   : > { %207 = vst [vmem:[%s860_s26 + $0xe0] sm:$0xff] %v206_v28 }
  0x2d   : > { %209 = vst [vmem:[%s860_s26 + $0xe8] sm:$0xff] %v208_v29 }
  0x2e   : > { %211 = vst [vmem:[%s860_s26 + $0xf0] sm:$0xff] %v210_v30 }
  0x2f   : > { %213 = vst [vmem:[%s860_s26 + $0xf8] sm:$0xff] %v212_v31 }
  0x30 PF: > { %p583_p5 = scmp.ge.s32.totalorder %s798_s14, 1  ;;  %p218_p6 = scmp.lt.s32.totalorder %s798_s14, 3 }
  0x32   : > { %p219_p7 = pnand %p583_p5, %p218_p6 }
  0x33   : > { %s225_s27 = sand.u32 (!%p219_p7), 1, %s790_s12   ;;  %s585_s7 = sshll.u32 (!%p219_p7), %s576_s15, 2 }
  0x34   : > { %222 = sbr.rel (%p219_p7) target bundleno = 233 (0xe9), region = 51  ;;  %s584_s28 = sshll.u32 (!%p219_p7), %s225_s27, 8 }
  0x35   : > { %s926_s29 = scalar_lea.vmem (!%p219_p7), [#allocation2], %s584_s28  ;;  %p250_p8 = scmp.lt.s32.totalorder (!%p219_p7), %s585_s7, 7 }
  0x39   : > { %v701_v32 = vld [vmem:[%s926_s29 + $0xe0] sm:$0xf]  ;;  %v748_v33 = vld [vmem:[%s926_s29 + $0xec] sm:$0xf0]  ;;  %v746_v34 = vld [vmem:[%s926_s29 + $0xe4] sm:$0xf] }
  0x3a   : > { %v702_v35 = vor.u32 %v748_v33, %v701_v32  ;;  %v703_v36 = vld [vmem:[%s926_s29 + $0xf0] sm:$0xf0]  ;;  %v709_v37 = vld [vmem:[%s926_s29 + $0xe8] sm:$0xf]  ;;  %v749_v38 = vld [vmem:[%s926_s29 + $0xf4] sm:$0xf0] }
  0x3b   : > { %v706_v39 = vor.u32 %v746_v34, %v703_v36  ;;  %v710_v40 = vor.u32 %v749_v38, %v709_v37  ;;  %v747_v41 = vld [vmem:[%s926_s29 + $0xec] sm:$0xf]  ;;  %v711_v42 = vld [vmem:[%s926_s29 + $0xf8] sm:$0xf0]  ;;  %v685_v43 = vld [vmem:[%s926_s29 + $0xc0] sm:$0xf] }
  0x3c   : > { %454 = vmatpush.bf16.msra.mxu0 %v702_v35  ;;  %v714_v44 = vor.u32 %v747_v41, %v711_v42  ;;  %v744_v45 = vld [vmem:[%s926_s29 + $0xcc] sm:$0xf0]  ;;  %v742_v46 = vld [vmem:[%s926_s29 + $0xc4] sm:$0xf]  ;;  %v687_v47 = vld [vmem:[%s926_s29 + $0xd0] sm:$0xf0] }
  0x3d   : > { %467 = vmatpush.bf16.msra.mxu1 %v706_v39  ;;  %480 = vmatpush.bf16.msra.mxu2 %v710_v40  ;;  %v686_v48 = vor.u32 %v744_v45, %v685_v43  ;;  %v690_v49 = vor.u32 %v742_v46, %v687_v47  ;;  %v693_v50 = vld [vmem:[%s926_s29 + $0xc8] sm:$0xf]  ;;  %v745_v51 = vld [vmem:[%s926_s29 + $0xd4] sm:$0xf0]  ;;  %v743_v52 = vld [vmem:[%s926_s29 + $0xcc] sm:$0xf] }
  0x3e   : > { %493 = vmatpush.bf16.msra.mxu3 %v714_v44  ;;  %v694_v53 = vor.u32 %v745_v51, %v693_v50  ;;  %v695_v54 = vld [vmem:[%s926_s29 + $0xd8] sm:$0xf0]  ;;  %v669_v55 = vld [vmem:[%s926_s29 + $0xa0] sm:$0xf]  ;;  %v740_v56 = vld [vmem:[%s926_s29 + $0xac] sm:$0xf0] }
  0x3f   : > { %v698_v57 = vor.u32 %v743_v52, %v695_v54  ;;  %v738_v58 = vld [vmem:[%s926_s29 + $0xa4] sm:$0xf]  ;;  %v671_v59 = vld [vmem:[%s926_s29 + $0xb0] sm:$0xf0]  ;;  %v677_v60 = vld [vmem:[%s926_s29 + $0xa8] sm:$0xf]  ;;  %v670_v61 = vor.u32 %v740_v56, %v669_v55 }
  0x40   : > { %455 = vmatpush.bf16.msra.mxu0 %v686_v48  ;;  %v741_v62 = vld [vmem:[%s926_s29 + $0xb4] sm:$0xf0]  ;;  %v739_v63 = vld [vmem:[%s926_s29 + $0xac] sm:$0xf]  ;;  %v679_v0 = vld [vmem:[%s926_s29 + $0xb8] sm:$0xf0]  ;;  %v674_v1 = vor.u32 %v738_v58, %v671_v59 }
  0x41   : > { %468 = vmatpush.bf16.msra.mxu1 %v690_v49  ;;  %481 = vmatpush.bf16.msra.mxu2 %v694_v53  ;;  %v678_v2 = vor.u32 %v741_v62, %v677_v60  ;;  %v653_v3 = vld [vmem:[%s926_s29 + $0x80] sm:$0xf]  ;;  %v736_v4 = vld [vmem:[%s926_s29 + $0x8c] sm:$0xf0]  ;;  %v734_v5 = vld [vmem:[%s926_s29 + $0x84] sm:$0xf]  ;;  %v682_v6 = vor.u32 %v739_v63, %v679_v0 }
  0x42   : > { %494 = vmatpush.bf16.msra.mxu3 %v698_v57  ;;  %v655_v7 = vld [vmem:[%s926_s29 + $0x90] sm:$0xf0]  ;;  %v661_v8 = vld [vmem:[%s926_s29 + $0x88] sm:$0xf]  ;;  %v737_v9 = vld [vmem:[%s926_s29 + $0x94] sm:$0xf0]  ;;  %v654_v12 = vor.u32 %v736_v4, %v653_v3 }
  0x43   : > { %v735_v10 = vld [vmem:[%s926_s29 + $0x8c] sm:$0xf]  ;;  %v663_v11 = vld [vmem:[%s926_s29 + $0x98] sm:$0xf0]  ;;  %v658_v13 = vor.u32 %v734_v5, %v655_v7  ;;  %v662_v14 = vor.u32 %v737_v9, %v661_v8  ;;  %v637_v15 = vld [vmem:[%s926_s29 + $0x60] sm:$0xf] }
  0x44   : > { %456 = vmatpush.bf16.msra.mxu0 %v670_v61  ;;  %v732_v16 = vld [vmem:[%s926_s29 + $0x6c] sm:$0xf0]  ;;  %v730_v17 = vld [vmem:[%s926_s29 + $0x64] sm:$0xf]  ;;  %v666_v18 = vor.u32 %v735_v10, %v663_v11  ;;  %v639_v19 = vld [vmem:[%s926_s29 + $0x70] sm:$0xf0] }
  0x45   : > { %469 = vmatpush.bf16.msra.mxu1 %v674_v1  ;;  %482 = vmatpush.bf16.msra.mxu2 %v678_v2  ;;  %v645_v20 = vld [vmem:[%s926_s29 + $0x68] sm:$0xf]  ;;  %v733_v21 = vld [vmem:[%s926_s29 + $0x74] sm:$0xf0]  ;;  %v731_v22 = vld [vmem:[%s926_s29 + $0x6c] sm:$0xf]  ;;  %v638_v24 = vor.u32 %v732_v16, %v637_v15  ;;  %v642_v25 = vor.u32 %v730_v17, %v639_v19 }
  0x46   : > { %495 = vmatpush.bf16.msra.mxu3 %v682_v6  ;;  %v647_v23 = vld [vmem:[%s926_s29 + $0x78] sm:$0xf0]  ;;  %v646_v26 = vor.u32 %v733_v21, %v645_v20  ;;  %v621_v27 = vld [vmem:[%s926_s29 + $0x40] sm:$0xf]  ;;  %v728_v28 = vld [vmem:[%s926_s29 + $0x4c] sm:$0xf0] }
  0x47   : > { %v726_v29 = vld [vmem:[%s926_s29 + $0x44] sm:$0xf]  ;;  %v650_v30 = vor.u32 %v731_v22, %v647_v23  ;;  %v623_v31 = vld [vmem:[%s926_s29 + $0x50] sm:$0xf0]  ;;  %v629_v32 = vld [vmem:[%s926_s29 + $0x48] sm:$0xf]  ;;  %v622_v36 = vor.u32 %v728_v28, %v621_v27 }
  0x48   : > { %457 = vmatpush.bf16.msra.mxu0 %v654_v12  ;;  %v729_v33 = vld [vmem:[%s926_s29 + $0x54] sm:$0xf0]  ;;  %v727_v34 = vld [vmem:[%s926_s29 + $0x4c] sm:$0xf]  ;;  %v631_v35 = vld [vmem:[%s926_s29 + $0x58] sm:$0xf0]  ;;  %v626_v38 = vor.u32 %v726_v29, %v623_v31 }
  0x49   : > { %470 = vmatpush.bf16.msra.mxu1 %v658_v13  ;;  %483 = vmatpush.bf16.msra.mxu2 %v662_v14  ;;  %v605_v37 = vld [vmem:[%s926_s29 + $0x20] sm:$0xf]  ;;  %v630_v39 = vor.u32 %v729_v33, %v629_v32  ;;  %v724_v40 = vld [vmem:[%s926_s29 + $0x2c] sm:$0xf0]  ;;  %v722_v41 = vld [vmem:[%s926_s29 + $0x24] sm:$0xf]  ;;  %v634_v43 = vor.u32 %v727_v34, %v631_v35 }
  0x4a   : > { %496 = vmatpush.bf16.msra.mxu3 %v666_v18  ;;  %v607_v42 = vld [vmem:[%s926_s29 + $0x30] sm:$0xf0]  ;;  %v613_v44 = vld [vmem:[%s926_s29 + $0x28] sm:$0xf]  ;;  %v725_v45 = vld [vmem:[%s926_s29 + $0x34] sm:$0xf0]  ;;  %v606_v50 = vor.u32 %v724_v40, %v605_v37 }
  0x4b   : > { %v288_v46 = vld [vmem:[%s1015_s2] sm:$0xff]  ;;  %v723_v47 = vld [vmem:[%s926_s29 + $0x2c] sm:$0xf]  ;;  %v615_v48 = vld [vmem:[%s926_s29 + $0x38] sm:$0xf0]  ;;  %v800_v49 = vmov 0   ;;  %v610_v51 = vor.u32 %v722_v41, %v607_v42  ;;  %v614_v52 = vor.u32 %v725_v45, %v613_v44 }
  0x4c   : > { %458 = vmatpush.bf16.msra.mxu0 %v638_v24  ;;  %775 = vset.pattern.permute.xlu0 %v800_v49  ;;  %v589_v53 = vld [vmem:[%s926_s29] sm:$0xf]  ;;  %v720_v54 = vld [vmem:[%s926_s29 + $0xc] sm:$0xf0]  ;;  %v718_v55 = vld [vmem:[%s926_s29 + $0x4] sm:$0xf]  ;;  %v618_v56 = vor.u32 %v723_v47, %v615_v48 }
  0x4d   : > { %471 = vmatpush.bf16.msra.mxu1 %v642_v25  ;;  %484 = vmatpush.bf16.msra.mxu2 %v646_v26  ;;  %v591_v57 = vld [vmem:[%s926_s29 + $0x10] sm:$0xf0]  ;;  %v597_v58 = vld [vmem:[%s926_s29 + $0x8] sm:$0xf]  ;;  %v721_v59 = vld [vmem:[%s926_s29 + $0x14] sm:$0xf0]  ;;  %v590_v62 = vor.u32 %v720_v54, %v589_v53 }
  0x4e   : > { %497 = vmatpush.bf16.msra.mxu3 %v650_v30  ;;  %291 = vperm.xlu0 %775, %v288_v46   ;;  %v719_v60 = vld [vmem:[%s926_s29 + $0xc] sm:$0xf]  ;;  %v599_v61 = vld [vmem:[%s926_s29 + $0x18] sm:$0xf0]  ;;  %v594_v63 = vor.u32 %v718_v55, %v591_v57  ;;  %v598_v0 = vor.u32 %v721_v59, %v597_v58  ;;  %v255_v2 = vld [vmem:[%s1013_s0] sm:$0xf] }
  0x4f   : > { %v602_v1 = vor.u32 %v719_v60, %v599_v61  ;;  %s1021_s7 = smov (!%p250_p8, %s585_s7), 7 }
  0x50   : > { %459 = vmatpush.bf16.msra.mxu0 %v622_v36  ;;  %s586_s8 = sshll.u32 %s1021_s7, 3 }
  0x51   : > { %472 = vmatpush.bf16.msra.mxu1 %v626_v38  ;;  %485 = vmatpush.bf16.msra.mxu2 %v630_v39  ;;  %s253_s11 = scalar_lea.vmem %s1016_s3, %s586_s8 }
  0x52   : > { %498 = vmatpush.bf16.msra.mxu3 %v634_v43 }
  0x54   : > { %460 = vmatpush.bf16.msra.mxu0 %v606_v50 }
  0x55   : > { %473 = vmatpush.bf16.msra.mxu1 %v610_v51  ;;  %486 = vmatpush.bf16.msra.mxu2 %v614_v52 }
  0x56   : > { %499 = vmatpush.bf16.msra.mxu3 %v618_v56 }
  0x58   : > { %461 = vmatpush.bf16.msra.mxu0 %v590_v62 }
  0x59   : > { %474 = vmatpush.bf16.msra.mxu1 %v594_v63  ;;  %487 = vmatpush.bf16.msra.mxu2 %v598_v0 }
  0x5a   : > { %500 = vmatpush.bf16.msra.mxu3 %v602_v1 }
  0x5b   : > { %462 = vmatmul.bf16.vlgmr.msra.gmra.mxu0 %v255_v2 }
  0x5c   : > { %475 = vmatmul.bf16.vlgmr.msra.gmra.mxu1 %v255_v2  ;;  %488 = vmatmul.bf16.vlgmr.msra.gmra.mxu2 %v255_v2 }
  0x5d   : > { %501 = vmatmul.bf16.vlgmr.msra.gmra.mxu3 %v255_v2 }
  0xc0   : > { %v292_v3 = vpop.permute.xlu0 %291 }
  0xd8   : > { %v463_v4 = vpop.f32.mrf.mxu0 }
  0xd9   : > { %v476_v5 = vpop.f32.mrf.mxu1  ;;  %v464_v6 = vadd.f32 %v463_v4, %v292_v3 }
  0xda   : > { %v477_v7 = vadd.f32 %v476_v5, %v292_v3 }
  0xdb   : > { %v506_v8 = vmax.f32 %v464_v6, 0.0 }
  0xdc   : > { %v507_v9 = vmax.f32 %v477_v7, 0.0 }
  0xdd   : > { %510 = vst [vmem:[%s253_s11] sm:$0xff] %v506_v8 }
  0xde   : > { %511 = vst [vmem:[%s253_s11 + $0x8] sm:$0xff] %v507_v9 }
  0xdf   : > { %v489_v10 = vpop.f32.mrf.mxu2 }
  0xe0   : > { %v490_v11 = vadd.f32 %v489_v10, %v292_v3  ;;  %v502_v12 = vpop.f32.mrf.mxu3  ;;  %v465_v13 = vpop.f32.mrf.mxu0 }
  0xe1   : > { %v503_v14 = vadd.f32 %v502_v12, %v292_v3  ;;  %v478_v15 = vpop.f32.mrf.mxu1 }
  0xe2   : > { %v508_v16 = vmax.f32 %v490_v11, 0.0 }
  0xe3   : > { %v509_v17 = vmax.f32 %v503_v14, 0.0 }
  0xe4   : > { %512 = vst [vmem:[%s253_s11 + $0x10] sm:$0xff] %v508_v16 }
  0xe5   : > { %513 = vst [vmem:[%s253_s11 + $0x18] sm:$0xff] %v509_v17 }
  0xe7   : > { %v491_v18 = vpop.f32.mrf.mxu2 }
  0xe8   : > { %v504_v19 = vpop.f32.mrf.mxu3 }
  0xe9 PF: > { %p10_p9 = scmp.ge.s32.totalorder %s838_s16, 4   ;;  %s1017_s12 = smov %s794_s13 }
  0xea   : > { %s1018_s13 = smov %s847_s19  ;;  %s1019_s14 = smov %s838_s16 }
  0xeb   :  { %12 = sbr.rel (!%p10_p9) target bundleno = 2 (0x2), region = 90 }

// kernel: meta_learner_forward.6
= control target key start
LH: loop header
LB: loop body
LE: loop exit
PB: predicated region body
PF: predicated region fallthrough
CT: control target
= control target key end

     0   :  { %vm28_vm0 = vcmask 523264   ;;  %vm58_vm1 = vcmask 228352   ;;  %s173_s1 = inlined_call_operand.vmem [shape: f32[64,28], index: 1, kind: input, shape index: {}]   ;;  %s174_s2 = inlined_call_operand.vmem [shape: f32[1,28], index: 2, kind: input, shape index: {}]   ;;  %s175_s0 = inlined_call_operand.vmem [shape: f32[16,64], index: 0, kind: input, shape index: {}]   ;;  %s176_s3 = inlined_call_operand.vmem [shape: f32[16,28], index: 3, kind: output, shape index: {}]  }
   0x1   :  { %v23_v0 = vld [vmem:[%s173_s1 + $0x38] sm:$0xff]  ;;  %v22_v1 = vld [vmem:[%s173_s1 + $0x30] sm:$0xff]  ;;  %v21_v2 = vld [vmem:[%s173_s1 + $0x28] sm:$0xff] }
   0x2   :  { %43 = vmatpush.msra.mxu0 %v23_v0  ;;  %91 = vmatpush.msra.mxu1 %v23_v0  ;;  %v20_v3 = vld [vmem:[%s173_s1 + $0x20] sm:$0xff]  ;;  %v19_v4 = vld [vmem:[%s173_s1 + $0x18] sm:$0xff]  ;;  %v18_v5 = vld [vmem:[%s173_s1 + $0x10] sm:$0xff] }
   0x3   :  { %v17_v6 = vld [vmem:[%s173_s1 + $0x8] sm:$0xff]  ;;  %v16_v7 = vld [vmem:[%s173_s1] sm:$0xff] }
   0x4   :  { %44 = vmatpush.msra.mxu0 %v22_v1  ;;  %92 = vmatpush.msra.mxu1 %v22_v1  ;;  %v14_v8 = vld [vmem:[%s175_s0] sm:$0xff]  ;;  %v15_v9 = vld [vmem:[%s175_s0 + $0x8] sm:$0xff] }
   0x5   :  { %v99_v10 = vld [vmem:[%s174_s2] ss:$0 sm:$0xff] }
   0x6   :  { %45 = vmatpush.msra.mxu0 %v21_v2  ;;  %93 = vmatpush.msra.mxu1 %v21_v2 }
   0x8   :  { %46 = vmatpush.msra.mxu0 %v20_v3  ;;  %94 = vmatpush.msra.mxu1 %v20_v3 }
   0xa   :  { %47 = vmatpush.msra.mxu0 %v19_v4  ;;  %95 = vmatpush.msra.mxu1 %v19_v4 }
   0xc   :  { %48 = vmatpush.msra.mxu0 %v18_v5  ;;  %96 = vmatpush.msra.mxu1 %v18_v5 }
   0xe   :  { %49 = vmatpush.msra.mxu0 %v17_v6  ;;  %97 = vmatpush.msra.mxu1 %v17_v6 }
  0x10   :  { %50 = vmatpush.msra.mxu0 %v16_v7  ;;  %98 = vmatpush.msra.mxu1 %v16_v7 }
  0x11   :  { %89 = vmatmul.msk.f32.vlgmr.msra.gmra.mxu0 %vm28_vm0, %v14_v8  ;;  %90 = vmatmul.msk.f32.vlgmr.msra.gmra.mxu1 %vm28_vm0, %v15_v9 }
  0x8e   :  { %v52_v11 = vpop.f32.mrf.mxu0  ;;  %v55_v13 = vpop.f32.mrf.mxu1 }
  0x8f   :  { %v53_v12 = vadd.f32 %v99_v10, %v52_v11  ;;  %v56_v15 = vadd.f32 %v99_v10, %v55_v13 }
  0x91   :  { %v59_v14 = vsel %vm58_vm1, %v53_v12, -inf  ;;  %v62_v16 = vsel %vm58_vm1, %v56_v15, -inf }
  0x92   :  { %60 = vmax.xlane.f32.xlu0 %v59_v14 }
  0x9a   :  { %63 = vmax.xlane.f32.xlu0 %v62_v16 }
 0x105   :  { %v61_v17 = vpop.xlane.xlu0 %60 }
 0x106   :  { %v65_v18 = vsub.f32 %v53_v12, %v61_v17 }
 0x108   :  { %v67_v19 = vmul.f32 1.442695, %v65_v18 }
 0x10a   :  { %100 = vpow2.f32 %v67_v19 }
 0x10d   :  { %v64_v20 = vpop.xlane.xlu0 %63 }
 0x10e   :  { %v66_v21 = vsub.f32 %v56_v15, %v64_v20 }
 0x110   :  { %v101_v22 = vpop.eup %100  ;;  %v69_v23 = vmul.f32 1.442695, %v66_v21 }
 0x111   :  { %v71_v24 = vsel %vm58_vm1, %v101_v22, 0.0 }
 0x112   :  { %102 = vpow2.f32 %v69_v23  ;;  %72 = vadd.xlane.f32.xlu1 %v71_v24 }
 0x118   :  { %v103_v25 = vpop.eup %102 }
 0x119   :  { %v74_v26 = vsel %vm58_vm1, %v103_v25, 0.0 }
 0x11a   :  { %75 = vadd.xlane.f32.xlu1 %v74_v26 }
 0x185   :  { %v73_v27 = vpop.xlane.xlu1 %72 }
 0x186   :  { %104 = vlog2.f32 %v73_v27 }
 0x18c   :  { %v105_v28 = vpop.eup %104 }
 0x18d   :  { %v78_v29 = vmul.f32 0.6931472, %v105_v28  ;;  %v76_v30 = vpop.xlane.xlu1 %75 }
 0x18e   :  { %106 = vlog2.f32 %v76_v30 }
 0x18f   :  { %v81_v31 = vsub.f32 %v65_v18, %v78_v29 }
 0x191   :  { %83 = vst.msk [vmem:[%s176_s3] sm:$0xff] %vm58_vm1, %v81_v31 }
 0x194   :  { %v107_v32 = vpop.eup %106 }
 0x195   :  { %v80_v33 = vmul.f32 0.6931472, %v107_v32 }
 0x197   :  { %v82_v34 = vsub.f32 %v66_v21, %v80_v33 }
 0x199   :  { %84 = vst.msk [vmem:[%s176_s3 + $0x8] sm:$0xff] %vm58_vm1, %v82_v34 }

// kernel: meta_learner_forward.5
= control target key start
LH: loop header
LB: loop body
LE: loop exit
PB: predicated region body
PF: predicated region fallthrough
CT: control target
= control target key end

     0   :  { %s1209_s18 = smov 0   ;;  %s1607_s0 = inlined_call_operand.vmem [shape: f32[8,2,128], index: 0, kind: input, shape index: {}]   ;;  %s1608_s1 = inlined_call_operand.vmem [shape: f32[2,128,96], index: 1, kind: input, shape index: {}]   ;;  %s1609_s2 = inlined_call_operand.vmem [shape: f32[2,1,96], index: 2, kind: input, shape index: {}]   ;;  %s1610_s3 = inlined_call_operand.vmem [shape: f32[2,32,96], index: 3, kind: input, shape index: {}]   ;;  %s1611_s4 = inlined_call_operand.vmem [shape: f32[2,1,96], index: 4, kind: input, shape index: {}]   ;;  %s1612_s5 = inlined_call_operand.vmem [shape: f32[2,8,2,32], index: 5, kind: output, shape index: {}]  }
   0x1 LB: > { %s1215_s19 = sadd.s32 4294967295, %s1174_s18   ;;  %p1073_p0 = scmp.ge.s32.totalorder %s1174_s18, 1  ;;  %s1174_s18 = sphi %s1209_s18, %s15_s18  }
   0x2   : > { %p213_p1 = scmp.lt.s32.totalorder %s1174_s18, 3 }
   0x4   : > { %p214_p2 = pnand %p1073_p0, %p213_p1 }
   0x5   : > { %p252_p3 = scmp.lt.s32.totalorder (!%p214_p2), %s1215_s19, 1  ;;  %s1177_s25 = smov (!%p214_p2), 64  }
   0x6   : > { %217 = sbr.rel (%p214_p2) target bundleno = 4696 (0x1258), region = 40  ;;  %p489_p4 = scmp.eq.s32.totalorder (!%p214_p2), %s1215_s19, 0 }
   0x7   : > { %s1178_s29 = smov (!%p214_p2), 96  }
   0xb   : > { %s1221_s20 = scalar_select %p252_p3, %s1215_s19, 1  ;;  %v290_v16 = vld [vmem:[%s1607_s0] sm:$0x3]  ;;  %v1082_v17 = vld [vmem:[%s1607_s0 + $0x6] sm:$0x3]  ;;  %v1176_v24 = vmov 0.0  }
   0xc   : > { %v1083_v18 = vld [vmem:[%s1607_s0 + $0x8] sm:$0x3]  ;;  %v1086_v19 = vld [vmem:[%s1607_s0 + $0xe] sm:$0x3]  ;;  %vm314_vm0 = vcmask 779264   ;;  %vm551_vm1 = vcmask 254976  }
   0xd   : > { %s1104_s21 = sshll.u32 %s1221_s20, 7  ;;  %s259_s27 = scalar_lea.vmem %s1609_s2, %s1221_s20  ;;  %v1081_v49 = vld [vmem:[%s1607_s0 + $0x4] sm:$0x3]  ;;  %v1080_v50 = vld [vmem:[%s1607_s0 + $0x2] sm:$0x3]  ;;  %vm497_vm2 = vcmask 261120  }
   0xe   : > { %s1227_s24 = scalar_lea.vmem %s1608_s1, %s1104_s21  ;;  %s1105_s7 = sshll.u32 %s1221_s20, 5  ;;  %v1458_v25 = vld [vmem:[%s259_s27] ss:$0 sm:$0xff]  ;;  %v1085_v51 = vld [vmem:[%s1607_s0 + $0xc] sm:$0x3] }
   0xf   : > { %v1230_v0 = vld [vmem:[%s1227_s24 + $0x78] sm:$0xff]  ;;  %v1233_v1 = vld [vmem:[%s1227_s24 + $0x70] sm:$0xff]  ;;  %v1238_v2 = vld [vmem:[%s1227_s24 + $0x68] sm:$0xff]  ;;  %s264_s10 = scalar_lea.vmem %s1610_s3, %s1105_s7  ;;  %s267_s17 = scalar_lea.vmem %s1611_s4, %s1221_s20 }
  0x10   : > { %294 = vmatpush.msra.mxu0 %v1230_v0  ;;  %366 = vmatpush.msra.mxu3 %v1230_v0  ;;  %v1245_v3 = vld [vmem:[%s1227_s24 + $0x60] sm:$0xff]  ;;  %v1256_v4 = vld [vmem:[%s1227_s24 + $0x58] sm:$0xff]  ;;  %v1263_v5 = vld [vmem:[%s1227_s24 + $0x50] sm:$0xff]  ;;  %s1480_s26 = scalar_select %p489_p4, 0, 7 }
  0x11   : > { %342 = vmatpush.msra.mxu2 %v1230_v0  ;;  %318 = vmatpush.msra.mxu1 %v1230_v0  ;;  %v1270_v6 = vld [vmem:[%s1227_s24 + $0x48] sm:$0xff]  ;;  %v1277_v7 = vld [vmem:[%s1227_s24 + $0x40] sm:$0xff]  ;;  %v1284_v8 = vld [vmem:[%s1227_s24 + $0x38] sm:$0xff]  ;;  %s1106_s13 = sshll.u32 %s1221_s20, 4 }
  0x12   : > { %295 = vmatpush.msra.mxu0 %v1233_v1  ;;  %367 = vmatpush.msra.mxu3 %v1233_v1  ;;  %v1291_v9 = vld [vmem:[%s1227_s24 + $0x30] sm:$0xff]  ;;  %v1298_v10 = vld [vmem:[%s1227_s24 + $0x28] sm:$0xff]  ;;  %v1305_v11 = vld [vmem:[%s1227_s24 + $0x20] sm:$0xff]  ;;  %s1087_s27 = sshll.u32 %s1480_s26, 1  ;;  %s1526_s16 = scalar_lea.vmem %s1612_s5, %s1106_s13 }
  0x13   : > { %343 = vmatpush.msra.mxu2 %v1233_v1  ;;  %319 = vmatpush.msra.mxu1 %v1233_v1  ;;  %v1312_v12 = vld [vmem:[%s1227_s24 + $0x18] sm:$0xff]  ;;  %v1319_v13 = vld [vmem:[%s1227_s24 + $0x10] sm:$0xff]  ;;  %v1326_v14 = vld [vmem:[%s1227_s24 + $0x8] sm:$0xff]  ;;  %s492_s28 = scalar_lea.vmem [#allocation2], %s1087_s27 }
  0x14   : > { %296 = vmatpush.msra.mxu0 %v1238_v2  ;;  %368 = vmatpush.msra.mxu3 %v1238_v2  ;;  %v1333_v15 = vld [vmem:[%s1227_s24] sm:$0xff]  ;;  %v1415_v20 = vld [vmem:[%s264_s10 + $0x18] sm:$0xff]  ;;  %v1421_v21 = vld [vmem:[%s264_s10 + $0x10] sm:$0xff]  ;;  %s553_s20 = scalar_select %p489_p4, 1, 6 }
  0x15   : > { %344 = vmatpush.msra.mxu2 %v1238_v2  ;;  %320 = vmatpush.msra.mxu1 %v1238_v2  ;;  %v1425_v22 = vld [vmem:[%s264_s10 + $0x8] sm:$0xff]  ;;  %v1435_v23 = vld [vmem:[%s264_s10] sm:$0xff]  ;;  %s610_s24 = scalar_select %p489_p4, 2, 5 }
  0x16   : > { %297 = vmatpush.msra.mxu0 %v1245_v3  ;;  %369 = vmatpush.msra.mxu3 %v1245_v3  ;;  %v1471_v32 = vld [vmem:[%s267_s17] ss:$0 sm:$0xff]  ;;  %v1084_v52 = vld [vmem:[%s1607_s0 + $0xa] sm:$0x3]  ;;  %s550_s17 = scalar_lea.vmem %s1526_s16, %s1087_s27  ;;  %s1088_s21 = sshll.u32 %s553_s20, 1 }
  0x17   : > { %345 = vmatpush.msra.mxu2 %v1245_v3  ;;  %321 = vmatpush.msra.mxu1 %v1245_v3  ;;  %s555_s22 = scalar_lea.vmem [#allocation2], %s1088_s21  ;;  %s608_s23 = scalar_lea.vmem %s1526_s16, %s1088_s21 }
  0x18   : > { %298 = vmatpush.msra.mxu0 %v1256_v4  ;;  %370 = vmatpush.msra.mxu3 %v1256_v4  ;;  %s1090_s26 = sshll.u32 %s610_s24, 1 }
  0x19   : > { %346 = vmatpush.msra.mxu2 %v1256_v4  ;;  %322 = vmatpush.msra.mxu1 %v1256_v4  ;;  %s612_s27 = scalar_lea.vmem [#allocation2], %s1090_s26 }
  0x1a   : > { %299 = vmatpush.msra.mxu0 %v1263_v5  ;;  %371 = vmatpush.msra.mxu3 %v1263_v5  ;;  %s667_s30 = scalar_select %p489_p4, 3, 4 }
  0x1b   : > { %347 = vmatpush.msra.mxu2 %v1263_v5  ;;  %323 = vmatpush.msra.mxu1 %v1263_v5  ;;  %s724_s9 = scalar_select %p489_p4, 4, 3 }
  0x1c   : > { %300 = vmatpush.msra.mxu0 %v1270_v6  ;;  %372 = vmatpush.msra.mxu3 %v1270_v6  ;;  %s1092_s6 = sshll.u32 %s667_s30, 1 }
  0x1d   : > { %348 = vmatpush.msra.mxu2 %v1270_v6  ;;  %324 = vmatpush.msra.mxu1 %v1270_v6  ;;  %s669_s7 = scalar_lea.vmem [#allocation2], %s1092_s6  ;;  %s722_s8 = scalar_lea.vmem %s1526_s16, %s1092_s6 }
  0x1e   : > { %301 = vmatpush.msra.mxu0 %v1277_v7  ;;  %373 = vmatpush.msra.mxu3 %v1277_v7  ;;  %s1094_s10 = sshll.u32 %s724_s9, 1 }
  0x1f   : > { %349 = vmatpush.msra.mxu2 %v1277_v7  ;;  %325 = vmatpush.msra.mxu1 %v1277_v7  ;;  %s726_s11 = scalar_lea.vmem [#allocation2], %s1094_s10  ;;  %s779_s12 = scalar_lea.vmem %s1526_s16, %s1094_s10 }
  0x20   : > { %302 = vmatpush.msra.mxu0 %v1284_v8  ;;  %374 = vmatpush.msra.mxu3 %v1284_v8  ;;  %s781_s13 = scalar_select %p489_p4, 5, 2 }
  0x21   : > { %350 = vmatpush.msra.mxu2 %v1284_v8  ;;  %326 = vmatpush.msra.mxu1 %v1284_v8  ;;  %s838_s20 = scalar_select %p489_p4, 6, 1 }
  0x22   : > { %303 = vmatpush.msra.mxu0 %v1291_v9  ;;  %375 = vmatpush.msra.mxu3 %v1291_v9  ;;  %s1096_s14 = sshll.u32 %s781_s13, 1 }
  0x23   : > { %351 = vmatpush.msra.mxu2 %v1291_v9  ;;  %327 = vmatpush.msra.mxu1 %v1291_v9  ;;  %s783_s15 = scalar_lea.vmem [#allocation2], %s1096_s14  ;;  %s1098_s21 = sshll.u32 %s838_s20, 1 }
  0x24   : > { %304 = vmatpush.msra.mxu0 %v1298_v10  ;;  %376 = vmatpush.msra.mxu3 %v1298_v10  ;;  %s895_s24 = scalar_select %p489_p4, 7, 0 }
  0x25   : > { %352 = vmatpush.msra.mxu2 %v1298_v10  ;;  %328 = vmatpush.msra.mxu1 %v1298_v10 }
  0x26   : > { %305 = vmatpush.msra.mxu0 %v1305_v11  ;;  %377 = vmatpush.msra.mxu3 %v1305_v11 }
  0x27   : > { %353 = vmatpush.msra.mxu2 %v1305_v11  ;;  %329 = vmatpush.msra.mxu1 %v1305_v11 }
  0x28   : > { %306 = vmatpush.msra.mxu0 %v1312_v12  ;;  %378 = vmatpush.msra.mxu3 %v1312_v12 }
  0x29   : > { %354 = vmatpush.msra.mxu2 %v1312_v12  ;;  %330 = vmatpush.msra.mxu1 %v1312_v12 }
  0x2a   : > { %307 = vmatpush.msra.mxu0 %v1319_v13  ;;  %379 = vmatpush.msra.mxu3 %v1319_v13 }
  0x2b   : > { %355 = vmatpush.msra.mxu2 %v1319_v13  ;;  %331 = vmatpush.msra.mxu1 %v1319_v13 }
  0x2c   : > { %308 = vmatpush.msra.mxu0 %v1326_v14  ;;  %380 = vmatpush.msra.mxu3 %v1326_v14 }
  0x2d   : > { %356 = vmatpush.msra.mxu2 %v1326_v14  ;;  %332 = vmatpush.msra.mxu1 %v1326_v14 }
  0x2e   : > { %309 = vmatpush.msra.mxu0 %v1333_v15  ;;  %381 = vmatpush.msra.mxu3 %v1333_v15 }
  0x2f   : > { %310 = vmatmul.f32.vlgmr.msra.gmra.mxu0 %v290_v16  ;;  %382 = vmatmul.f32.vlgmr.msra.gmra.mxu3 %v1082_v17 }
  0x30   : > { %390 = vmatpush.msrb.mxu0 %v1230_v0  ;;  %462 = vmatpush.msrb.mxu3 %v1230_v0 }
  0x31   : > { %357 = vmatpush.msra.mxu2 %v1333_v15  ;;  %333 = vmatpush.msra.mxu1 %v1333_v15 }
  0x32   : > { %391 = vmatpush.msrb.mxu0 %v1233_v1  ;;  %463 = vmatpush.msrb.mxu3 %v1233_v1 }
  0x33   : > { %438 = vmatpush.msrb.mxu2 %v1230_v0  ;;  %414 = vmatpush.msrb.mxu1 %v1230_v0 }
  0x34   : > { %392 = vmatpush.msrb.mxu0 %v1238_v2  ;;  %464 = vmatpush.msrb.mxu3 %v1238_v2 }
  0x35   : > { %439 = vmatpush.msrb.mxu2 %v1233_v1  ;;  %415 = vmatpush.msrb.mxu1 %v1233_v1 }
  0x36   : > { %393 = vmatpush.msrb.mxu0 %v1245_v3  ;;  %465 = vmatpush.msrb.mxu3 %v1245_v3 }
  0x37   : > { %440 = vmatpush.msrb.mxu2 %v1238_v2  ;;  %416 = vmatpush.msrb.mxu1 %v1238_v2 }
  0x38   : > { %394 = vmatpush.msrb.mxu0 %v1256_v4  ;;  %466 = vmatpush.msrb.mxu3 %v1256_v4 }
  0x39   : > { %441 = vmatpush.msrb.mxu2 %v1245_v3  ;;  %417 = vmatpush.msrb.mxu1 %v1245_v3 }
  0x3a   : > { %395 = vmatpush.msrb.mxu0 %v1263_v5  ;;  %467 = vmatpush.msrb.mxu3 %v1263_v5 }
  0x3b   : > { %442 = vmatpush.msrb.mxu2 %v1256_v4  ;;  %418 = vmatpush.msrb.mxu1 %v1256_v4 }
  0x3c   : > { %396 = vmatpush.msrb.mxu0 %v1270_v6  ;;  %468 = vmatpush.msrb.mxu3 %v1270_v6 }
  0x3d   : > { %443 = vmatpush.msrb.mxu2 %v1263_v5  ;;  %419 = vmatpush.msrb.mxu1 %v1263_v5 }
  0x3e   : > { %397 = vmatpush.msrb.mxu0 %v1277_v7  ;;  %469 = vmatpush.msrb.mxu3 %v1277_v7 }
  0x3f   : > { %444 = vmatpush.msrb.mxu2 %v1270_v6  ;;  %420 = vmatpush.msrb.mxu1 %v1270_v6 }
  0x40   : > { %398 = vmatpush.msrb.mxu0 %v1284_v8  ;;  %470 = vmatpush.msrb.mxu3 %v1284_v8 }
  0x41   : > { %445 = vmatpush.msrb.mxu2 %v1277_v7  ;;  %421 = vmatpush.msrb.mxu1 %v1277_v7 }
  0x42   : > { %399 = vmatpush.msrb.mxu0 %v1291_v9  ;;  %471 = vmatpush.msrb.mxu3 %v1291_v9 }
  0x43   : > { %446 = vmatpush.msrb.mxu2 %v1284_v8  ;;  %422 = vmatpush.msrb.mxu1 %v1284_v8 }
  0x44   : > { %400 = vmatpush.msrb.mxu0 %v1298_v10  ;;  %472 = vmatpush.msrb.mxu3 %v1298_v10 }
  0x45   : > { %447 = vmatpush.msrb.mxu2 %v1291_v9  ;;  %423 = vmatpush.msrb.mxu1 %v1291_v9 }
  0x46   : > { %401 = vmatpush.msrb.mxu0 %v1305_v11  ;;  %473 = vmatpush.msrb.mxu3 %v1305_v11 }
  0x47   : > { %448 = vmatpush.msrb.mxu2 %v1298_v10  ;;  %424 = vmatpush.msrb.mxu1 %v1298_v10 }
  0x48   : > { %402 = vmatpush.msrb.mxu0 %v1312_v12  ;;  %474 = vmatpush.msrb.mxu3 %v1312_v12 }
  0x49   : > { %449 = vmatpush.msrb.mxu2 %v1305_v11  ;;  %425 = vmatpush.msrb.mxu1 %v1305_v11 }
  0x4a   : > { %403 = vmatpush.msrb.mxu0 %v1319_v13  ;;  %475 = vmatpush.msrb.mxu3 %v1319_v13 }
  0x4b   : > { %450 = vmatpush.msrb.mxu2 %v1312_v12  ;;  %426 = vmatpush.msrb.mxu1 %v1312_v12 }
  0x4c   : > { %404 = vmatpush.msrb.mxu0 %v1326_v14  ;;  %476 = vmatpush.msrb.mxu3 %v1326_v14 }
  0x4d   : > { %451 = vmatpush.msrb.mxu2 %v1319_v13  ;;  %427 = vmatpush.msrb.mxu1 %v1319_v13 }
  0x4e   : > { %405 = vmatpush.msrb.mxu0 %v1333_v15  ;;  %477 = vmatpush.msrb.mxu3 %v1333_v15 }
  0x4f   : > { %406 = vmatmul.f32.vlgmr.msrb.gmra.mxu0 %v1083_v18  ;;  %478 = vmatmul.f32.vlgmr.msrb.gmra.mxu3 %v1086_v19 }
  0x50   : > { %513 = vmatpush.msra.mxu0 %v1415_v20  ;;  %685 = vmatpush.msra.mxu3 %v1415_v20 }
  0x51   : > { %452 = vmatpush.msrb.mxu2 %v1326_v14  ;;  %428 = vmatpush.msrb.mxu1 %v1326_v14 }
  0x52   : > { %514 = vmatpush.msra.mxu0 %v1421_v21  ;;  %686 = vmatpush.msra.mxu3 %v1421_v21 }
  0x53   : > { %453 = vmatpush.msrb.mxu2 %v1333_v15  ;;  %429 = vmatpush.msrb.mxu1 %v1333_v15 }
  0x54   : > { %515 = vmatpush.msra.mxu0 %v1425_v22  ;;  %687 = vmatpush.msra.mxu3 %v1425_v22 }
  0x55   : > { %358 = vmatmul.f32.vlgmr.msra.gmra.mxu2 %v1081_v49  ;;  %334 = vmatmul.f32.vlgmr.msra.gmra.mxu1 %v1080_v50 }
  0x56   : > { %516 = vmatpush.msra.mxu0 %v1435_v23  ;;  %688 = vmatpush.msra.mxu3 %v1435_v23 }
  0x57   : > { %517 = vmatmul.f32.vlgmr.msra.gmra.mxu0 %v1176_v24  ;;  %571 = vmatpush.msra.mxu1 %v1415_v20 }
  0x58   : > { %742 = vmatpush.msrb.mxu0 %v1415_v20  ;;  %913 = vmatpush.msrb.mxu3 %v1415_v20 }
  0x59   : > { %628 = vmatpush.msra.mxu2 %v1415_v20  ;;  %572 = vmatpush.msra.mxu1 %v1421_v21 }
  0x5a   : > { %743 = vmatpush.msrb.mxu0 %v1421_v21  ;;  %914 = vmatpush.msrb.mxu3 %v1421_v21 }
  0x5b   : > { %629 = vmatpush.msra.mxu2 %v1421_v21  ;;  %573 = vmatpush.msra.mxu1 %v1425_v22 }
  0x5c   : > { %744 = vmatpush.msrb.mxu0 %v1425_v22  ;;  %915 = vmatpush.msrb.mxu3 %v1425_v22 }
  0x5d   : > { %630 = vmatpush.msra.mxu2 %v1425_v22  ;;  %574 = vmatpush.msra.mxu1 %v1435_v23 }
  0x5e   : > { %745 = vmatpush.msrb.mxu0 %v1435_v23  ;;  %916 = vmatpush.msrb.mxu3 %v1435_v23 }
  0x5f   : > { %631 = vmatpush.msra.mxu2 %v1435_v23  ;;  %430 = vmatmul.f32.vlgmr.msrb.gmra.mxu1 %v1084_v52 }
  0x60   : > { %454 = vmatmul.f32.vlgmr.msrb.gmra.mxu2 %v1085_v51  ;;  %799 = vmatpush.msrb.mxu1 %v1415_v20 }
  0x61   : > { %856 = vmatpush.msrb.mxu2 %v1415_v20 }
  0x62   : > { %800 = vmatpush.msrb.mxu1 %v1421_v21 }
  0x63   : > { %857 = vmatpush.msrb.mxu2 %v1421_v21 }
  0x64   : > { %801 = vmatpush.msrb.mxu1 %v1425_v22 }
  0x65   : > { %858 = vmatpush.msrb.mxu2 %v1425_v22 }
  0x66   : > { %802 = vmatpush.msrb.mxu1 %v1435_v23 }
  0x67   : > { %859 = vmatpush.msrb.mxu2 %v1435_v23 }
  0xac   : > { %v311_v26 = vpop.f32.mrf.mxu0 }
  0xad   : > { %v312_v27 = vadd.f32 %v1458_v25, %v311_v26 }
  0xaf   : > { %315 = vst.msk [vmem:[#allocation2] sm:$0x3] %vm314_vm0, %v312_v27 }
  0xb2   : > { %v383_v28 = vpop.f32.mrf.mxu3 }
  0xb3   : > { %v384_v29 = vadd.f32 %v1458_v25, %v383_v28 }
  0xb5   : > { %387 = vst.msk [vmem:[#allocation2 + $0x6] sm:$0x3] %vm314_vm0, %v384_v29 }
  0xcc   : > { %v407_v30 = vpop.f32.mrf.mxu0 }
  0xcd   : > { %v408_v31 = vadd.f32 %v1458_v25, %v407_v30 }
  0xcf   : > { %411 = vst.msk [vmem:[#allocation2 + $0x8] sm:$0x3] %vm314_vm0, %v408_v31 }
  0xd2   : > { %v479_v33 = vpop.f32.mrf.mxu3  ;;  %v335_v58 = vpop.f32.mrf.mxu1 }
  0xd3   : > { %v480_v34 = vadd.f32 %v1458_v25, %v479_v33  ;;  %v336_v59 = vadd.f32 %v1458_v25, %v335_v58 }
  0xd4   : > { %v518_v35 = vpop.f32.mrf.mxu0 }
  0xd5   : > { %483 = vst.msk [vmem:[#allocation2 + $0xe] sm:$0x3] %vm314_vm0, %v480_v34  ;;  %v519_v36 = vadd.f32 %v1471_v32, %v518_v35 }
  0xd7   : > { %528 = vrot.lane.b32.xlu0 %v519_v36, %s1177_s25 }
  0xd8   : > { %v359_v60 = vpop.f32.mrf.mxu2 }
  0xd9   : > { %v360_v61 = vadd.f32 %v1458_v25, %v359_v60 }
  0xdc   : > { %v493_v37 = vld [vmem:[%s492_s28] sm:$0x3]  ;;  %v431_v62 = vpop.f32.mrf.mxu1  ;;  %s665_s28 = scalar_lea.vmem %s1526_s16, %s1090_s26  ;;  %s1100_s26 = sshll.u32 %s895_s24, 1 }
  0xdd   : > { %v521_v38 = vadd.f32 %v519_v36, %v493_v37  ;;  %339 = vst.msk [vmem:[#allocation2 + $0x2] sm:$0x3] %vm314_vm0, %v336_v59  ;;  %v432_v63 = vadd.f32 %v1458_v25, %v431_v62  ;;  %s950_s19 = scalar_lea.vmem %s1526_s16, %s1100_s26 }
  0xde   : > { %363 = vst.msk [vmem:[#allocation2 + $0x4] sm:$0x3] %vm314_vm0, %v360_v61 }
  0xdf   : > { %v522_v39 = vsub.f32 0.0, %v521_v38  ;;  %435 = vst.msk [vmem:[#allocation2 + $0xa] sm:$0x3] %vm314_vm0, %v432_v63 }
  0xe1   : > { %v523_v40 = vmul.f32 1.442695, %v522_v39 }
  0xe3   : > { %1120 = vpow2.f32 %v523_v40  ;;  %v455_v0 = vpop.f32.mrf.mxu2 }
  0xe4   : > { %v456_v1 = vadd.f32 %v1458_v25, %v455_v0 }
  0xe6   : > { %459 = vst.msk [vmem:[#allocation2 + $0xc] sm:$0x3] %vm314_vm0, %v456_v1 }
  0xe9   : > { %v1121_v41 = vpop.eup %1120 }
  0xea   : > { %v525_v42 = vadd.f32 1.0, %v1121_v41 }
  0xec   : > { %1122 = vrcp.f32 %v525_v42 }
  0xed   : > { %v556_v5 = vld [vmem:[%s555_s22] sm:$0x3]  ;;  %s840_s22 = scalar_lea.vmem [#allocation2], %s1098_s21 }
  0xee   : > { %v613_v25 = vld [vmem:[%s612_s27] sm:$0x3]  ;;  %s897_s27 = scalar_lea.vmem [#allocation2], %s1100_s26 }
  0xf2   : > { %v1123_v43 = vpop.eup %1122 }
  0xf3   : > { %v538_v53 = vsub.f32 1.0, %v1123_v43  ;;  %v544_v55 = vmul.f32 0.0, %v1123_v43 }
 0x149   : > { %v529_v44 = vpop.permute.xlu0 %528 }
 0x14a   : > { %v531_v45 = vmul.f32 %v1123_v43, %v529_v44 }
 0x14c   : > { %533 = vrot.lane.b32.xlu0 %v531_v45, %s1177_s25 }
 0x1be   : > { %v534_v46 = vpop.permute.xlu0 %533 }
 0x1bf   : > { %v536_v47 = vadd.f32 %v534_v46, %v493_v37  ;;  %v670_v46 = vld [vmem:[%s669_s7] sm:$0x3] }
 0x1c1   : > { %1124 = vtanh.f32 %v536_v47 }
 0x1c7   : > { %v1125_v48 = vpop.eup %1124 }
 0x1c8   : > { %540 = vrot.lane.b32.xlu1 %v1125_v48, %s1178_s29 }
 0x23a   : > { %v541_v54 = vpop.permute.xlu1 %540 }
 0x23b   : > { %v543_v56 = vmul.f32 %v541_v54, %v538_v53 }
 0x23d   : > { %v545_v57 = vadd.f32 %v544_v55, %v543_v56 }
 0x23f   : > { %547 = vrot.lane.b32.xlu1 %v545_v57, %s1178_s29 }
 0x2b1   : > { %v548_v2 = vpop.permute.xlu1 %547 }
 0x2b2   : > { %552 = vst.msk [vmem:[%s550_s17] sm:$0x3] %vm551_vm1, %v548_v2  ;;  %1089 = vmatmul.msk.f32.vlgmr.msra.gmra.mxu1 %vm497_vm2, %v548_v2  ;;  %v727_v2 = vld [vmem:[%s726_s11] sm:$0x3]  ;;  %s836_s17 = scalar_lea.vmem %s1526_s16, %s1096_s14 }
 0x32f   : > { %v576_v3 = vpop.f32.mrf.mxu1 }
 0x330   : > { %v577_v4 = vadd.f32 %v1471_v32, %v576_v3 }
 0x332   : > { %586 = vrot.lane.b32.xlu2 %v577_v4, %s1177_s25  ;;  %v579_v6 = vadd.f32 %v577_v4, %v556_v5 }
 0x334   : > { %v580_v7 = vsub.f32 0.0, %v579_v6 }
 0x336   : > { %v581_v8 = vmul.f32 1.442695, %v580_v7 }
 0x338   : > { %1126 = vpow2.f32 %v581_v8 }
 0x33e   : > { %v1127_v9 = vpop.eup %1126 }
 0x33f   : > { %v583_v10 = vadd.f32 1.0, %v1127_v9 }
 0x341   : > { %1128 = vrcp.f32 %v583_v10 }
 0x347   : > { %v1129_v11 = vpop.eup %1128 }
 0x348   : > { %v596_v17 = vsub.f32 1.0, %v1129_v11  ;;  %v602_v19 = vmul.f32 %v1129_v11, %v545_v57 }
 0x38c   : > { %v587_v12 = vpop.permute.xlu2 %586 }
 0x38d   : > { %v589_v13 = vmul.f32 %v1129_v11, %v587_v12 }
 0x38f   : > { %591 = vrot.lane.b32.xlu2 %v589_v13, %s1177_s25 }
 0x3e9   : > { %v592_v14 = vpop.permute.xlu2 %591 }
 0x3ea   : > { %v594_v15 = vadd.f32 %v592_v14, %v556_v5 }
 0x3ec   : > { %1130 = vtanh.f32 %v594_v15 }
 0x3f2   : > { %v1131_v16 = vpop.eup %1130 }
 0x3f3   : > { %598 = vrot.lane.b32.xlu0 %v1131_v16, %s1178_s29 }
 0x465   : > { %v599_v18 = vpop.permute.xlu0 %598 }
 0x466   : > { %v601_v20 = vmul.f32 %v599_v18, %v596_v17 }
 0x468   : > { %v603_v21 = vadd.f32 %v602_v19, %v601_v20 }
 0x46a   : > { %605 = vrot.lane.b32.xlu1 %v603_v21, %s1178_s29 }
 0x4dc   : > { %v606_v22 = vpop.permute.xlu1 %605 }
 0x4dd   : > { %609 = vst.msk [vmem:[%s608_s23] sm:$0x3] %vm551_vm1, %v606_v22  ;;  %1091 = vmatmul.msk.f32.vlgmr.msra.gmra.mxu2 %vm497_vm2, %v606_v22  ;;  %v784_v22 = vld [vmem:[%s783_s15] sm:$0x3]  ;;  %s893_s23 = scalar_lea.vmem %s1526_s16, %s1098_s21 }
 0x560   : > { %v633_v23 = vpop.f32.mrf.mxu2 }
 0x561   : > { %v634_v24 = vadd.f32 %v1471_v32, %v633_v23 }
 0x563   : > { %643 = vrot.lane.b32.xlu2 %v634_v24, %s1177_s25  ;;  %v636_v26 = vadd.f32 %v634_v24, %v613_v25 }
 0x565   : > { %v637_v27 = vsub.f32 0.0, %v636_v26 }
 0x567   : > { %v638_v28 = vmul.f32 1.442695, %v637_v27 }
 0x569   : > { %1132 = vpow2.f32 %v638_v28 }
 0x56f   : > { %v1133_v29 = vpop.eup %1132 }
 0x570   : > { %v640_v30 = vadd.f32 1.0, %v1133_v29 }
 0x572   : > { %1134 = vrcp.f32 %v640_v30 }
 0x578   : > { %v1135_v31 = vpop.eup %1134 }
 0x579   : > { %v653_v38 = vsub.f32 1.0, %v1135_v31  ;;  %v659_v40 = vmul.f32 %v1135_v31, %v603_v21 }
 0x5bd   : > { %v644_v33 = vpop.permute.xlu2 %643 }
 0x5be   : > { %v646_v34 = vmul.f32 %v1135_v31, %v644_v33 }
 0x5c0   : > { %648 = vrot.lane.b32.xlu0 %v646_v34, %s1177_s25 }
 0x632   : > { %v649_v35 = vpop.permute.xlu0 %648 }
 0x633   : > { %v651_v36 = vadd.f32 %v649_v35, %v613_v25 }
 0x635   : > { %1136 = vtanh.f32 %v651_v36 }
 0x63b   : > { %v1137_v37 = vpop.eup %1136 }
 0x63c   : > { %655 = vrot.lane.b32.xlu1 %v1137_v37, %s1178_s29 }
 0x6ae   : > { %v656_v39 = vpop.permute.xlu1 %655 }
 0x6af   : > { %v658_v41 = vmul.f32 %v656_v39, %v653_v38 }
 0x6b1   : > { %v660_v42 = vadd.f32 %v659_v40, %v658_v41 }
 0x6b3   : > { %662 = vrot.lane.b32.xlu2 %v660_v42, %s1178_s29 }
 0x70d   : > { %v663_v43 = vpop.permute.xlu2 %662 }
 0x70e   : > { %666 = vst.msk [vmem:[%s665_s28] sm:$0x3] %vm551_vm1, %v663_v43  ;;  %1093 = vmatmul.msk.f32.vlgmr.msra.gmra.mxu3 %vm497_vm2, %v663_v43  ;;  %v841_v43 = vld [vmem:[%s840_s22] sm:$0x3] }
 0x791   : > { %v690_v44 = vpop.f32.mrf.mxu3 }
 0x792   : > { %v691_v45 = vadd.f32 %v1471_v32, %v690_v44 }
 0x794   : > { %700 = vrot.lane.b32.xlu0 %v691_v45, %s1177_s25  ;;  %v693_v47 = vadd.f32 %v691_v45, %v670_v46 }
 0x796   : > { %v694_v48 = vsub.f32 0.0, %v693_v47 }
 0x798   : > { %v695_v49 = vmul.f32 1.442695, %v694_v48 }
 0x79a   : > { %1138 = vpow2.f32 %v695_v49 }
 0x7a0   : > { %v1139_v50 = vpop.eup %1138 }
 0x7a1   : > { %v697_v51 = vadd.f32 1.0, %v1139_v50 }
 0x7a3   : > { %1140 = vrcp.f32 %v697_v51 }
 0x7a9   : > { %v1141_v52 = vpop.eup %1140 }
 0x7aa   : > { %v710_v58 = vsub.f32 1.0, %v1141_v52  ;;  %v716_v60 = vmul.f32 %v1141_v52, %v660_v42 }
 0x806   : > { %v701_v53 = vpop.permute.xlu0 %700 }
 0x807   : > { %v703_v54 = vmul.f32 %v1141_v52, %v701_v53 }
 0x809   : > { %705 = vrot.lane.b32.xlu1 %v703_v54, %s1177_s25 }
 0x87b   : > { %v706_v55 = vpop.permute.xlu1 %705 }
 0x87c   : > { %v708_v56 = vadd.f32 %v706_v55, %v670_v46 }
 0x87e   : > { %1142 = vtanh.f32 %v708_v56 }
 0x884   : > { %v1143_v57 = vpop.eup %1142 }
 0x885   : > { %712 = vrot.lane.b32.xlu2 %v1143_v57, %s1178_s29 }
 0x8df   : > { %v713_v59 = vpop.permute.xlu2 %712 }
 0x8e0   : > { %v715_v61 = vmul.f32 %v713_v59, %v710_v58 }
 0x8e2   : > { %v717_v62 = vadd.f32 %v716_v60, %v715_v61 }
 0x8e4   : > { %719 = vrot.lane.b32.xlu0 %v717_v62, %s1178_s29 }
 0x956   : > { %v720_v63 = vpop.permute.xlu0 %719 }
 0x957   : > { %723 = vst.msk [vmem:[%s722_s8] sm:$0x3] %vm551_vm1, %v720_v63  ;;  %1095 = vmatmul.msk.f32.vlgmr.msrb.gmra.mxu0 %vm497_vm2, %v720_v63  ;;  %v898_v63 = vld [vmem:[%s897_s27] sm:$0x3] }
 0x9d4   : > { %v747_v0 = vpop.f32.mrf.mxu0 }
 0x9d5   : > { %v748_v1 = vadd.f32 %v1471_v32, %v747_v0 }
 0x9d7   : > { %757 = vrot.lane.b32.xlu1 %v748_v1, %s1177_s25  ;;  %v750_v3 = vadd.f32 %v748_v1, %v727_v2 }
 0x9d9   : > { %v751_v4 = vsub.f32 0.0, %v750_v3 }
 0x9db   : > { %v752_v5 = vmul.f32 1.442695, %v751_v4 }
 0x9dd   : > { %1144 = vpow2.f32 %v752_v5 }
 0x9e3   : > { %v1145_v6 = vpop.eup %1144 }
 0x9e4   : > { %v754_v7 = vadd.f32 1.0, %v1145_v6 }
 0x9e6   : > { %1146 = vrcp.f32 %v754_v7 }
 0x9ec   : > { %v1147_v8 = vpop.eup %1146 }
 0x9ed   : > { %v767_v14 = vsub.f32 1.0, %v1147_v8  ;;  %v773_v16 = vmul.f32 %v1147_v8, %v717_v62 }
 0xa49   : > { %v758_v9 = vpop.permute.xlu1 %757 }
 0xa4a   : > { %v760_v10 = vmul.f32 %v1147_v8, %v758_v9 }
 0xa4c   : > { %762 = vrot.lane.b32.xlu2 %v760_v10, %s1177_s25 }
 0xaa6   : > { %v763_v11 = vpop.permute.xlu2 %762 }
 0xaa7   : > { %v765_v12 = vadd.f32 %v763_v11, %v727_v2 }
 0xaa9   : > { %1148 = vtanh.f32 %v765_v12 }
 0xaaf   : > { %v1149_v13 = vpop.eup %1148 }
 0xab0   : > { %769 = vrot.lane.b32.xlu0 %v1149_v13, %s1178_s29 }
 0xb22   : > { %v770_v15 = vpop.permute.xlu0 %769 }
 0xb23   : > { %v772_v17 = vmul.f32 %v770_v15, %v767_v14 }
 0xb25   : > { %v774_v18 = vadd.f32 %v773_v16, %v772_v17 }
 0xb27   : > { %776 = vrot.lane.b32.xlu1 %v774_v18, %s1178_s29 }
 0xb99   : > { %v777_v19 = vpop.permute.xlu1 %776 }
 0xb9a   : > { %780 = vst.msk [vmem:[%s779_s12] sm:$0x3] %vm551_vm1, %v777_v19  ;;  %1097 = vmatmul.msk.f32.vlgmr.msrb.gmra.mxu1 %vm497_vm2, %v777_v19 }
 0xc17   : > { %v804_v20 = vpop.f32.mrf.mxu1 }
 0xc18   : > { %v805_v21 = vadd.f32 %v1471_v32, %v804_v20 }
 0xc1a   : > { %814 = vrot.lane.b32.xlu2 %v805_v21, %s1177_s25  ;;  %v807_v23 = vadd.f32 %v805_v21, %v784_v22 }
 0xc1c   : > { %v808_v24 = vsub.f32 0.0, %v807_v23 }
 0xc1e   : > { %v809_v25 = vmul.f32 1.442695, %v808_v24 }
 0xc20   : > { %1150 = vpow2.f32 %v809_v25 }
 0xc26   : > { %v1151_v26 = vpop.eup %1150 }
 0xc27   : > { %v811_v27 = vadd.f32 1.0, %v1151_v26 }
 0xc29   : > { %1152 = vrcp.f32 %v811_v27 }
 0xc2f   : > { %v1153_v28 = vpop.eup %1152 }
 0xc30   : > { %v824_v35 = vsub.f32 1.0, %v1153_v28  ;;  %v830_v37 = vmul.f32 %v1153_v28, %v774_v18 }
 0xc74   : > { %v815_v29 = vpop.permute.xlu2 %814 }
 0xc75   : > { %v817_v30 = vmul.f32 %v1153_v28, %v815_v29 }
 0xc77   : > { %819 = vrot.lane.b32.xlu0 %v817_v30, %s1177_s25 }
 0xce9   : > { %v820_v31 = vpop.permute.xlu0 %819 }
 0xcea   : > { %v822_v33 = vadd.f32 %v820_v31, %v784_v22 }
 0xcec   : > { %1154 = vtanh.f32 %v822_v33 }
 0xcf2   : > { %v1155_v34 = vpop.eup %1154 }
 0xcf3   : > { %826 = vrot.lane.b32.xlu1 %v1155_v34, %s1178_s29 }
 0xd65   : > { %v827_v36 = vpop.permute.xlu1 %826 }
 0xd66   : > { %v829_v38 = vmul.f32 %v827_v36, %v824_v35 }
 0xd68   : > { %v831_v39 = vadd.f32 %v830_v37, %v829_v38 }
 0xd6a   : > { %833 = vrot.lane.b32.xlu2 %v831_v39, %s1178_s29 }
 0xdc4   : > { %v834_v40 = vpop.permute.xlu2 %833 }
 0xdc5   : > { %837 = vst.msk [vmem:[%s836_s17] sm:$0x3] %vm551_vm1, %v834_v40  ;;  %1099 = vmatmul.msk.f32.vlgmr.msrb.gmra.mxu2 %vm497_vm2, %v834_v40 }
 0xe48   : > { %v861_v41 = vpop.f32.mrf.mxu2 }
 0xe49   : > { %v862_v42 = vadd.f32 %v1471_v32, %v861_v41 }
 0xe4b   : > { %871 = vrot.lane.b32.xlu0 %v862_v42, %s1177_s25  ;;  %v864_v44 = vadd.f32 %v862_v42, %v841_v43 }
 0xe4d   : > { %v865_v45 = vsub.f32 0.0, %v864_v44 }
 0xe4f   : > { %v866_v46 = vmul.f32 1.442695, %v865_v45 }
 0xe51   : > { %1156 = vpow2.f32 %v866_v46 }
 0xe57   : > { %v1157_v47 = vpop.eup %1156 }
 0xe58   : > { %v868_v48 = vadd.f32 1.0, %v1157_v47 }
 0xe5a   : > { %1158 = vrcp.f32 %v868_v48 }
 0xe60   : > { %v1159_v49 = vpop.eup %1158 }
 0xe61   : > { %v881_v55 = vsub.f32 1.0, %v1159_v49  ;;  %v887_v57 = vmul.f32 %v1159_v49, %v831_v39 }
 0xebd   : > { %v872_v50 = vpop.permute.xlu0 %871 }
 0xebe   : > { %v874_v51 = vmul.f32 %v1159_v49, %v872_v50 }
 0xec0   : > { %876 = vrot.lane.b32.xlu1 %v874_v51, %s1177_s25 }
 0xf32   : > { %v877_v52 = vpop.permute.xlu1 %876 }
 0xf33   : > { %v879_v53 = vadd.f32 %v877_v52, %v841_v43 }
 0xf35   : > { %1160 = vtanh.f32 %v879_v53 }
 0xf3b   : > { %v1161_v54 = vpop.eup %1160 }
 0xf3c   : > { %883 = vrot.lane.b32.xlu2 %v1161_v54, %s1178_s29 }
 0xf96   : > { %v884_v56 = vpop.permute.xlu2 %883 }
 0xf97   : > { %v886_v58 = vmul.f32 %v884_v56, %v881_v55 }
 0xf99   : > { %v888_v59 = vadd.f32 %v887_v57, %v886_v58 }
 0xf9b   : > { %890 = vrot.lane.b32.xlu0 %v888_v59, %s1178_s29 }
0x100d   : > { %v891_v60 = vpop.permute.xlu0 %890 }
0x100e   : > { %894 = vst.msk [vmem:[%s893_s23] sm:$0x3] %vm551_vm1, %v891_v60  ;;  %1101 = vmatmul.msk.f32.vlgmr.msrb.gmra.mxu3 %vm497_vm2, %v891_v60 }
0x1091   : > { %v918_v61 = vpop.f32.mrf.mxu3 }
0x1092   : > { %v919_v62 = vadd.f32 %v1471_v32, %v918_v61 }
0x1094   : > { %928 = vrot.lane.b32.xlu1 %v919_v62, %s1177_s25  ;;  %v921_v0 = vadd.f32 %v919_v62, %v898_v63 }
0x1096   : > { %v922_v1 = vsub.f32 0.0, %v921_v0 }
0x1098   : > { %v923_v2 = vmul.f32 1.442695, %v922_v1 }
0x109a   : > { %1162 = vpow2.f32 %v923_v2 }
0x10a0   : > { %v1163_v3 = vpop.eup %1162 }
0x10a1   : > { %v925_v4 = vadd.f32 1.0, %v1163_v3 }
0x10a3   : > { %1164 = vrcp.f32 %v925_v4 }
0x10a9   : > { %v1165_v5 = vpop.eup %1164 }
0x10aa   : > { %v938_v10 = vsub.f32 1.0, %v1165_v5  ;;  %v944_v12 = vmul.f32 %v1165_v5, %v888_v59 }
0x1106   : > { %v929_v6 = vpop.permute.xlu1 %928 }
0x1107   : > { %v931_v7 = vmul.f32 %v1165_v5, %v929_v6 }
0x1109   : > { %933 = vrot.lane.b32.xlu2 %v931_v7, %s1177_s25 }
0x1163   : > { %v934_v32 = vpop.permute.xlu2 %933 }
0x1164   : > { %v936_v8 = vadd.f32 %v934_v32, %v898_v63 }
0x1166   : > { %1166 = vtanh.f32 %v936_v8 }
0x116c   : > { %v1167_v9 = vpop.eup %1166 }
0x116d   : > { %940 = vrot.lane.b32.xlu0 %v1167_v9, %s1178_s29 }
0x11df   : > { %v941_v11 = vpop.permute.xlu0 %940 }
0x11e0   : > { %v943_v13 = vmul.f32 %v941_v11, %v938_v10 }
0x11e2   : > { %v945_v14 = vadd.f32 %v944_v12, %v943_v13 }
0x11e4   : > { %947 = vrot.lane.b32.xlu1 %v945_v14, %s1178_s29 }
0x1256   : > { %v948_v15 = vpop.permute.xlu1 %947 }
0x1257   : > { %951 = vst.msk [vmem:[%s950_s19] sm:$0x3] %vm551_vm1, %v948_v15 }
0x1258 PF: > { %s15_s18 = sadd.s32 1, %s1174_s18  }
0x1259   : > { %p12_p5 = scmp.ge.s32.totalorder %s15_s18, 4  }
0x125b   :  { %14 = sbr.rel (!%p12_p5) target bundleno = 1 (0x1), region = 109 }

// kernel: meta_learner_forward.7
= control target key start
LH: loop header
LB: loop body
LE: loop exit
PB: predicated region body
PF: predicated region fallthrough
CT: control target
= control target key end

     0   :  { %v27_v0 = vlaneseq  ;;  %s241_s0 = inlined_call_operand.vmem [shape: f32[8,2,128], index: 0, kind: input, shape index: {}]   ;;  %s242_s1 = inlined_call_operand.vmem [shape: f32[2,128], index: 1, kind: input, shape index: {}]   ;;  %s243_s2 = inlined_call_operand.vmem [shape: f32[2,128], index: 2, kind: input, shape index: {}]   ;;  %s244_s3 = inlined_call_operand.vmem [shape: f32[2,128], index: 3, kind: input, shape index: {}]   ;;  %s245_s4 = inlined_call_operand.vmem [shape: s32[2,1], index: 4, kind: input, shape index: {}]   ;;  %s246_s5 = inlined_call_operand.vmem [shape: f32[2,1], index: 5, kind: output, shape index: {}]  }
   0x1   :  { %v194_v1 = vld [vmem:[%s242_s1] sm:$0x3] }
   0x2   :  { %v199_v2 = vld [vmem:[%s243_s2] sm:$0x3]  ;;  %vm21_vm0 = vcmp.gt.f32.partialorder %v194_v1, 0.5  ;;  %v28_v5 = vand.u32 127, %v27_v0  ;;  %s217_s2 = smov 1  }
   0x3   :  { %v204_v3 = vld [vmem:[%s244_s3] sm:$0x3]  ;;  %vm23_vm1 = vcmp.gt.f32.partialorder %v199_v2, 0.5 }
   0x4   :  { %vm25_vm2 = vcmp.gt.f32.partialorder %v204_v3, 0.5  ;;  %v26_v4 = vld [vmem:[%s245_s4] sm:$0x3]  ;;  %vm29_vm3 = vcmp.le.s32.totalorder %v28_v5, 1 }
   0x5   :  { %v31_v6 = vld [vmem:[%s241_s0] sm:$0x3]  ;;  %vm30_vm4 = vmand %vm29_vm3, %vm23_vm1 }
   0x6   :  { %v32_v7 = vsel %vm30_vm4, %v31_v6, -1e+30  }
   0x7   :  { %v150_v8 = vmov %v32_v7  }
   0x8 LB: > { %v158_v9 = vmov 0   ;;  %s159_s3 = smov 1   ;;  %v68_v10 = vstv %s156_s2  ;;  %s160_s4 = smov 2   ;;  %vm40_vm6 = vcmp.ge.s32.totalorder %v28_v5, 1  ;;  %s156_s2 = sphi %s217_s2, %s38_s2   ;;  %v152_v8 = vphi %v150_v8, %v151_v8  }
   0x9   : > { %128 = vset.pattern.permute.xlu1 %v158_v9  ;;  %129 = vset.pattern.permute.xlu0 %v158_v9  ;;  %vm69_vm5 = vcmp.lt.s32.totalorder %v68_v10, %v26_v4  ;;  %s108_s27 = sshll.u32 %s156_s2, 1  ;;  %s38_s2 = sadd.s32 1, %s156_s2  }
   0xa   : > { %41 = vrot.lane.b32.xlu0 %v152_v8, %s159_s3  ;;  %v70_v11 = vsel %vm69_vm5, 1, %v158_v9  ;;  %s64_s30 = scalar_lea.vmem %s241_s0, %s108_s27  ;;  %p35_p0 = scmp.ge.s32.totalorder %s38_s2, 8  }
   0xb   : > { %72 = vperm.xlu1 %128, %v70_v11   ;;  %v65_v31 = vld [vmem:[%s64_s30] sm:$0x3]  ;;  %vm77_vm8 = vcmask (%p35_p0), 1041408   ;;  %vm92_vm9 = vcmask (%p35_p0), 1024  }
  0x12   : > { %44 = vrot.lane.b32.xlu0 %v152_v8, %s160_s4 }
  0x7c   : > { %v42_v12 = vpop.permute.xlu0 %41 }
  0x7d   : > { %v43_v13 = vsel %vm40_vm6, %v42_v12, -1e+30  ;;  %v73_v32 = vpop.permute.xlu1 %72 }
  0x7e   : > { %v47_v14 = vmax.f32 %v152_v8, %v43_v13  ;;  %vm74_vm7 = vcmp.eq.s32.totalorder %v73_v32, 1 }
  0x84   : > { %v45_v15 = vpop.permute.xlu0 %44 }
  0x85   : > { %v46_v16 = vsel %vm21_vm0, %v45_v15, -1e+30 }
  0x86   : > { %v48_v17 = vmax.f32 %v47_v14, %v46_v16 }
  0x88   : > { %v49_v18 = vsub.f32 %v152_v8, %v48_v17  ;;  %v52_v19 = vsub.f32 %v43_v13, %v48_v17  ;;  %v56_v20 = vsub.f32 %v46_v16, %v48_v17 }
  0x8a   : > { %v50_v21 = vmul.f32 1.442695, %v49_v18  ;;  %v53_v22 = vmul.f32 1.442695, %v52_v19  ;;  %v57_v23 = vmul.f32 1.442695, %v56_v20 }
  0x8c   : > { %130 = vpow2.f32 %v50_v21 }
  0x8d   : > { %132 = vpow2.f32 %v53_v22 }
  0x8e   : > { %134 = vpow2.f32 %v57_v23 }
  0x92   : > { %v131_v24 = vpop.eup %130 }
  0x93   : > { %v133_v25 = vpop.eup %132 }
  0x94   : > { %v55_v26 = vadd.f32 %v133_v25, %v131_v24  ;;  %v135_v27 = vpop.eup %134 }
  0x96   : > { %v59_v28 = vadd.f32 %v135_v27, %v55_v26 }
  0x98   : > { %136 = vlog2.f32 %v59_v28 }
  0x9e   : > { %v137_v29 = vpop.eup %136 }
  0x9f   : > { %v61_v30 = vmul.f32 0.6931472, %v137_v29 }
  0xa1   : > { %v62_v33 = vadd.f32 %v61_v30, %v48_v17 }
  0xa3   : > { %v66_v34 = vadd.f32 %v65_v31, %v62_v33  ;;  %37 = sbr.rel (!%p35_p0) target bundleno = 8 (0x8), region = 48 }
  0xa5   : > { %v67_v35 = vsel %vm23_vm1, %v66_v34, -1e+30 }
  0xa6   : > { %v75_v36 = vsel %vm74_vm7, %v67_v35, %v152_v8  }
  0xa7   : > { %v151_v8 = vmov %v75_v36   ;;  %v76_v37 = vsel (%p35_p0), %vm25_vm2, %v75_v36, -1e+30 }
  0xa8   :  { %v78_v38 = vsel %vm77_vm8, %v76_v37, -inf }
  0xa9   :  { %79 = vmax.xlane.f32.xlu0 %v78_v38 }
 0x11c   :  { %v80_v39 = vpop.xlane.xlu0 %79 }
 0x11d   :  { %v81_v40 = vsub.f32 %v75_v36, %v80_v39 }
 0x11f   :  { %v82_v41 = vmul.f32 1.442695, %v81_v40 }
 0x121   :  { %138 = vpow2.f32 %v82_v41 }
 0x127   :  { %v139_v42 = vpop.eup %138 }
 0x128   :  { %v84_v43 = vsel %vm25_vm2, %v139_v42, 0.0 }
 0x129   :  { %v85_v44 = vsel %vm77_vm8, %v84_v43, 0.0 }
 0x12a   :  { %86 = vadd.xlane.f32.xlu0 %v85_v44 }
 0x19d   :  { %v87_v45 = vpop.xlane.xlu0 %86 }
 0x19e   :  { %140 = vlog2.f32 %v87_v45 }
 0x1a4   :  { %v141_v46 = vpop.eup %140 }
 0x1a5   :  { %v89_v47 = vmul.f32 0.6931472, %v141_v46 }
 0x1a7   :  { %v90_v48 = vadd.f32 %v89_v47, %v80_v39 }
 0x1a9   :  { %v91_v49 = vsub.f32 0.0, %v90_v48 }
 0x1ab   :  { %93 = vst.msk [vmem:[%s246_s5] sm:$0x3] %vm92_vm9, %v91_v49 }

</bundles_post_ra>
